<compile_context>
chip_gen: v7x
topology: tpu7x:2x2x1
jax: 0.10.0
libtpu: 0.0.40
codegen_flags: <defaults>
</compile_context>

<pallas_src>
import math

import jax
import jax.numpy as jnp
from jax.experimental import pallas as pl
from jax.experimental.pallas import tpu as pltpu


def _round_up(x, m):
    return ((x + m - 1) // m) * m


# ---------------------------------------------------------------------------
# Host-side constants (plain JAX, data independent)
# ---------------------------------------------------------------------------
def dft_matrices(n):
    """Real/imag parts of the forward DFT matrix F and of conj(F)/n (inverse)."""
    k = jnp.arange(n, dtype=jnp.float32)
    ang = -2.0 * jnp.pi * jnp.outer(k, k) / n
    fr = jnp.cos(ang)
    fi = jnp.sin(ang)
    return fr, fi, fr / n, -fi / n


def kron_dft_operators(H, W):
    """Kronecker 2-D DFT operators acting on row-major flattened images.

    For x_flat = x.reshape(H*W) (row-major):
        fft2(x).reshape(-1)  == x_flat @ Kf      (Kf = kron(F_H, F_W), symmetric)
        ifft2(y).reshape(-1) == y_flat @ Kg      (Kg = kron(G_H, G_W), symmetric)
    """
    fhr, fhi, ghr, ghi = dft_matrices(H)
    fwr, fwi, gwr, gwi = dft_matrices(W)
    kfr = jnp.kron(fhr, fwr) - jnp.kron(fhi, fwi)
    kfi = jnp.kron(fhr, fwi) + jnp.kron(fhi, fwr)
    kgr = jnp.kron(ghr, gwr) - jnp.kron(ghi, gwi)
    kgi = jnp.kron(ghr, gwi) + jnp.kron(ghi, gwr)
    return (kfr.astype(jnp.float32), kfi.astype(jnp.float32),
            kgr.astype(jnp.float32), kgi.astype(jnp.float32))


def make_theta_loggabor(H, W):
    """Deterministic synthetic theta (H,W) and loggabor (2,H,W) filters."""
    yv = (jnp.arange(H, dtype=jnp.float32) - H // 2) / H
    xv = (jnp.arange(W, dtype=jnp.float32) - W // 2) / W
    x, y = jnp.meshgrid(xv, yv)
    theta = jnp.arctan2(-y, x)
    radius = jnp.sqrt(x * x + y * y)
    radius = radius.at[H // 2, W // 2].set(1.0)
    theta = jnp.fft.ifftshift(theta)
    radius = jnp.fft.ifftshift(radius)
    gabors = []
    for s in range(2):
        wavelength = 3.0 * (2.0 ** s)
        fo = 1.0 / wavelength
        lg = jnp.exp(-(jnp.log(radius / fo) ** 2) / (2.0 * jnp.log(0.65) ** 2))
        lg = lg.at[0, 0].set(0.0)
        gabors.append(lg)
    return theta.astype(jnp.float32), jnp.stack(gabors).astype(jnp.float32)


def make_combined_filters(theta, loggabor):
    """Fold the (orientation, scale) loops through the linear IFFT.

    energy0 = Re(ifft2(X * f_e0)),  f_e0 = sum_{o,s} loggabor[s]*spread[o]
    energy1 = Im(ifft2(X * f_e1)),  f_e1 = sum_s lg[s]*spread[0]
                                          + cos(pi/2) * sum_s lg[s]*spread[1]
    (exactly equal to the reference double loop by linearity;
     cos(pi/2) = 6.1e-17 is kept so this is exact).
    Returns (2, H*W) f32, row-major flattened.
    """
    sin_t = jnp.sin(theta)
    cos_t = jnp.cos(theta)
    spreads = []
    for o in range(2):
        angl = o * math.pi / 2.0
        ds = sin_t * math.cos(angl) - cos_t * math.sin(angl)
        dc = cos_t * math.cos(angl) + sin_t * math.sin(angl)
        dtheta = jnp.abs(jnp.arctan2(ds, dc))
        spreads.append((jnp.cos(dtheta) + 1.0) / 2.0)
    lg_sum = loggabor[0] + loggabor[1]
    f_e0 = lg_sum * (spreads[0] + spreads[1])
    f_e1 = lg_sum * (spreads[0] + math.cos(math.pi / 2.0) * spreads[1])
    hh, ww = f_e0.shape
    return jnp.stack([f_e0.reshape(hh * ww),
                      f_e1.reshape(hh * ww)]).astype(jnp.float32)


# ---------------------------------------------------------------------------
# Fused Pallas kernel: fft2 -> filter -> ifft2 -> phase -> q partial sum
# ---------------------------------------------------------------------------
def _atan_poly(u):
    # atan(u) for |u| <= tan(pi/8) ~ 0.414: odd Taylor through u^13 (Horner).
    u2 = u * u
    p = 1.0 / 13.0
    p = -1.0 / 11.0 + u2 * p
    p = 1.0 / 9.0 + u2 * p
    p = -1.0 / 7.0 + u2 * p
    p = 1.0 / 5.0 + u2 * p
    p = -1.0 / 3.0 + u2 * p
    p = 1.0 + u2 * p
    return u * p


def _atan2_nonneg_x(y, x):
    """atan2(y, x) for x >= |y| >= 0 (so the angle is already in [-pi/4, pi/4]).

    ONE half-angle reduction puts the polynomial argument at <= tan(pi/8);
    built only from sqrt / mul / approx-reciprocal (EUP + VPU slots).
    x == 0 and y == 0 -> 0 (matches atan2(0, 0)), which is what padded
    zero-rows produce.
    """
    s = jnp.sqrt(x * x + y * y)
    den = x + s
    den_safe = jnp.where(den > 0.0, den, 1.0)
    r = pl.reciprocal(den_safe, approx=True)
    r = r * (2.0 - den_safe * r)              # one Newton step -> ~f32 accuracy
    t = jnp.where(den > 0.0, y * r, 0.0)      # tan(theta/2), |t| <= tan(pi/8)
    return 2.0 * _atan_poly(t)


def _fsitm_kernel(logh_ref, ldr_ref, kfr_ref, kfi_ref, kgr_ref, kgi_ref,
                  filt_ref, out_ref):
    T = logh_ref.shape[0]
    f0 = filt_ref[0:1, :]      # (1, HW) combined real-part (energy0) filter
    f1 = filt_ref[1:2, :]      # (1, HW) combined imag-part (energy1) filter

    # Stack both image tiles so each kron operator is pushed to the MXU once.
    x = jnp.concatenate([ldr_ref[...], logh_ref[...]], axis=0)     # (2T, HW)

    # fft2 (row-major flattened): S = x @ kron(F_H, F_W)  (symmetric operator)
    sr = jnp.dot(x, kfr_ref[...], preferred_element_type=jnp.float32)
    si = jnp.dot(x, kfi_ref[...], preferred_element_type=jnp.float32)

    # ifft2 of the two filtered spectra; stack lhs operands that share a RHS:
    #   energy0 = (sr*f0) @ Kgr - (si*f0) @ Kgi
    #   energy1 = (si*f1) @ Kgr + (sr*f1) @ Kgi
    lhs_r = jnp.concatenate([sr * f0, si * f1], axis=0)            # (4T, HW)
    lhs_i = jnp.concatenate([si * f0, sr * f1], axis=0)            # (4T, HW)
    a = jnp.dot(lhs_r, kgr_ref[...], preferred_element_type=jnp.float32)
    b = jnp.dot(lhs_i, kgi_ref[...], preferred_element_type=jnp.float32)

    n = 2 * T
    e0 = a[:n] - b[:n]
    e1 = a[n:] + b[n:]
    odd = jnp.sqrt(e0 * e0 + e1 * e1)
    phase = _atan2_nonneg_x(e0, odd)     # (2T, HW): rows [:T] ldr, [T:] logh

    p = phase[:T] * phase[T:]            # phasel * phaseh
    # q integrand: -relu(-relu(p) + 1e-4) + 1e-4  ==  clamp(p, 0, 1e-4)
    t = jnp.minimum(jnp.maximum(p, 0.0), 1e-4)
    out_ref[0] = jnp.zeros((1, 1), jnp.float32) + 10000.0 * jnp.sum(t)


def fsitm_q_sum(logh_flat, ldr_flat, kfr, kfi, kgr, kgi, filt2, tile_rows=256):
    """Sum over all pixels of 10000*clamp(phasel*phaseh, 0, 1e-4).

    tile_rows=256 fills a v6e/v7x MXU; on v5e 128 is enough but 256 is still
    fine VMEM-wise at HW=256.
    """
    N, HW = logh_flat.shape
    T = min(_round_up(N, 8), tile_rows)          # rows per grid step (mult of 8)
    Np = _round_up(N, T)
    if Np != N:
        # Zero-padded images produce phase == 0 and contribute exactly 0.
        pad = ((0, Np - N), (0, 0))
        logh_flat = jnp.pad(logh_flat, pad)
        ldr_flat = jnp.pad(ldr_flat, pad)
    G = Np // T

    img_spec = pl.BlockSpec((T, HW), lambda i: (i, 0))
    kron_spec = pl.BlockSpec((HW, HW), lambda i: (0, 0))   # grid-invariant
    filt_spec = pl.BlockSpec((2, HW), lambda i: (0, 0))    # grid-invariant

    partials = pl.pallas_call(
        _fsitm_kernel,
        out_shape=jax.ShapeDtypeStruct((G, 1, 1), jnp.float32),
        grid=(G,),
        in_specs=[img_spec, img_spec,
                  kron_spec, kron_spec, kron_spec, kron_spec,
                  filt_spec],
        out_specs=pl.BlockSpec((1, 1, 1), lambda i: (i, 0, 0)),
        compiler_params=pltpu.CompilerParams(
            dimension_semantics=("parallel",),      # tiles shard across TCs
            vmem_limit_bytes=32 * 1024 * 1024),
    )(logh_flat, ldr_flat, kfr, kfi, kgr, kgi, filt2)
    return jnp.sum(partials)


# ---------------------------------------------------------------------------
# FSITM forward
# ---------------------------------------------------------------------------
def fsitm_forward(ldrimg, hdrimg, theta, loggabor):
    B, C, H, W = hdrimg.shape

    # Log-domain normalization of the HDR image (per-batch min/max over C*H*W).
    logh = jnp.log(hdrimg.astype(jnp.float32) + 1e-5)
    flat = logh.reshape(B, 1, -1)
    lmax = jnp.max(flat, axis=2)[..., None, None]
    lmin = jnp.min(flat, axis=2)[..., None, None]
    rng = lmax - lmin
    rng = jnp.where(rng > 0.0, rng, 1.0)   # guard constant channel (ref would /0)
    logh = (logh - lmin) * 255.0 / rng

    kfr, kfi, kgr, kgi = kron_dft_operators(H, W)
    filt2 = make_combined_filters(theta, loggabor)

    s = fsitm_q_sum(logh.reshape(B * C, H * W),
                    ldrimg.astype(jnp.float32).reshape(B * C, H * W),
                    kfr, kfi, kgr, kgi, filt2)
    q = s / float(B * C * H * W)
    return 1.0 - q


# ---------------------------------------------------------------------------
# Pure-JAX reference (mirrors the torch module) for a correctness check
# ---------------------------------------------------------------------------
def _phasecong100_ref(img, theta, loggabor):
    imagefft = jnp.fft.fft2(img)
    sintheta, costheta = jnp.sin(theta), jnp.cos(theta)
    energy0 = jnp.zeros_like(img)
    energy1 = jnp.zeros_like(img)
    for o in range(2):
        angl = o * math.pi / 2.0
        ds = sintheta * math.cos(angl) - costheta * math.sin(angl)
        dc = costheta * math.cos(angl) + sintheta * math.sin(angl)
        dtheta = jnp.abs(jnp.arctan2(ds, dc))
        spread = (jnp.cos(dtheta) + 1.0) / 2.0
        sume = jnp.zeros_like(img)
        sumo = jnp.zeros_like(img)
        for s in range(2):
            eo = jnp.fft.ifft2(imagefft * (loggabor[s] * spread))
            sume = sume + jnp.real(eo)
            sumo = sumo + jnp.imag(eo)
        energy0 = energy0 + sume
        energy1 = energy1 + math.cos(angl) * sumo
    oddv = jnp.sqrt(energy0 ** 2 + energy1 ** 2)
    return jnp.arctan2(energy0, oddv)


def _fsitm_ref(ldrimg, hdrimg, theta, loggabor):
    logh = jnp.log(hdrimg + 1e-5)
    flat = logh.reshape(logh.shape[0], 1, -1)
    lmax = jnp.max(flat, axis=2)[..., None, None]
    lmin = jnp.min(flat, axis=2)[..., None, None]
    logh = (logh - lmin) * 255.0 / (lmax - lmin)
    phaseh = _phasecong100_ref(logh, theta, loggabor)
    phasel = _phasecong100_ref(ldrimg, theta, loggabor)
    relu = lambda v: jnp.maximum(v, 0.0)
    q = jnp.mean(10000.0 * (-relu(-relu(phasel * phaseh) + 1e-4) + 1e-4))
    return 1.0 - q


if __name__ == "__main__":
    B, C, H, W = 2, 4, 16, 16
    key = jax.random.PRNGKey(0)
    k1, k2 = jax.random.split(key)
    ldrimg = jax.random.uniform(k1, (B, C, H, W), jnp.float32, 0.0, 255.0)
    hdrimg = jax.random.uniform(k2, (B, C, H, W), jnp.float32, 1e-3, 100.0)

    theta, loggabor = make_theta_loggabor(H, W)   # deterministic "module params"

    out = jax.jit(fsitm_forward)(ldrimg, hdrimg, theta, loggabor)
    out = jax.block_until_ready(out)
    assert out.shape == () and out.dtype == jnp.float32

    ref = _fsitm_ref(ldrimg, hdrimg, theta, loggabor)
    assert abs(float(out) - float(ref)) < 2e-2, (float(out), float(ref))

    print("KERNEL_OK")
</pallas_src>

<mosaic_0001>
module attributes {stable_mosaic.version = 11 : i64} {
  func.func @_fsitm_kernel(%arg0: i32, %arg1: memref<8x256xf32, #tpu.memory_space<vmem>>, %arg2: memref<8x256xf32, #tpu.memory_space<vmem>>, %arg3: memref<256x256xf32, #tpu.memory_space<vmem>>, %arg4: memref<256x256xf32, #tpu.memory_space<vmem>>, %arg5: memref<256x256xf32, #tpu.memory_space<vmem>>, %arg6: memref<256x256xf32, #tpu.memory_space<vmem>>, %arg7: memref<2x256xf32, #tpu.memory_space<vmem>>, %arg8: memref<1x1x1xf32, #tpu.memory_space<vmem>>) attributes {dimension_semantics = [#tpu.dimension_semantics<parallel>], iteration_bounds = array<i64: 1>, scalar_prefetch = 0 : i64, scratch_operands = 0 : i64, tpu.core_type = #tpu.core_type<tc>, window_params = [{transform_indices = @transform_0, window_bounds = array<i64: 8, 256>}, {transform_indices = @transform_1, window_bounds = array<i64: 8, 256>}, {pipeline_mode = #tpu.pipeline_mode<synchronous>, transform_indices = @transform_2, window_bounds = array<i64: 256, 256>}, {pipeline_mode = #tpu.pipeline_mode<synchronous>, transform_indices = @transform_3, window_bounds = array<i64: 256, 256>}, {pipeline_mode = #tpu.pipeline_mode<synchronous>, transform_indices = @transform_4, window_bounds = array<i64: 256, 256>}, {pipeline_mode = #tpu.pipeline_mode<synchronous>, transform_indices = @transform_5, window_bounds = array<i64: 256, 256>}, {pipeline_mode = #tpu.pipeline_mode<synchronous>, transform_indices = @transform_6, window_bounds = array<i64: 2, 256>}, {transform_indices = @transform_7, window_bounds = array<i64: 1, 1, 1>}]} {
    %c0 = arith.constant 0 : index
    %c0_0 = arith.constant 0 : index
    %0 = vector.load %arg7[%c0, %c0_0] : memref<2x256xf32, #tpu.memory_space<vmem>>, vector<1x256xf32>
    %c1 = arith.constant 1 : index
    %c0_1 = arith.constant 0 : index
    %1 = vector.load %arg7[%c1, %c0_1] : memref<2x256xf32, #tpu.memory_space<vmem>>, vector<1x256xf32>
    %c0_2 = arith.constant 0 : index
    %c0_3 = arith.constant 0 : index
    %2 = vector.load %arg2[%c0_2, %c0_3] : memref<8x256xf32, #tpu.memory_space<vmem>>, vector<8x256xf32>
    %c0_4 = arith.constant 0 : index
    %c0_5 = arith.constant 0 : index
    %3 = vector.load %arg1[%c0_4, %c0_5] : memref<8x256xf32, #tpu.memory_space<vmem>>, vector<8x256xf32>
    %4 = tpu.concatenate %2, %3 in 0 : vector<8x256xf32>, vector<8x256xf32> -> vector<16x256xf32>
    %c0_6 = arith.constant 0 : index
    %c0_7 = arith.constant 0 : index
    %5 = vector.load %arg3[%c0_6, %c0_7] : memref<256x256xf32, #tpu.memory_space<vmem>>, vector<256x256xf32>
    %cst = arith.constant dense<0.000000e+00> : vector<16x256xf32>
    %6 = tpu.matmul %4, %5, %cst {dimension_numbers = #tpu.dot_dimension_numbers<[1], [0], [0], [1], [0, 0, 1, 1], [], []>} : vector<16x256xf32>, vector<256x256xf32>, vector<16x256xf32> -> vector<16x256xf32>
    %c0_8 = arith.constant 0 : index
    %c0_9 = arith.constant 0 : index
    %7 = vector.load %arg4[%c0_8, %c0_9] : memref<256x256xf32, #tpu.memory_space<vmem>>, vector<256x256xf32>
    %cst_10 = arith.constant dense<0.000000e+00> : vector<16x256xf32>
    %8 = tpu.matmul %4, %7, %cst_10 {dimension_numbers = #tpu.dot_dimension_numbers<[1], [0], [0], [1], [0, 0, 1, 1], [], []>} : vector<16x256xf32>, vector<256x256xf32>, vector<16x256xf32> -> vector<16x256xf32>
    %9 = vector.broadcast %0 : vector<1x256xf32> to vector<16x256xf32>
    %10 = arith.mulf %6, %9 : vector<16x256xf32>
    %11 = vector.broadcast %1 : vector<1x256xf32> to vector<16x256xf32>
    %12 = arith.mulf %8, %11 : vector<16x256xf32>
    %13 = tpu.concatenate %10, %12 in 0 : vector<16x256xf32>, vector<16x256xf32> -> vector<32x256xf32>
    %14 = vector.broadcast %0 : vector<1x256xf32> to vector<16x256xf32>
    %15 = arith.mulf %8, %14 : vector<16x256xf32>
    %16 = vector.broadcast %1 : vector<1x256xf32> to vector<16x256xf32>
    %17 = arith.mulf %6, %16 : vector<16x256xf32>
    %18 = tpu.concatenate %15, %17 in 0 : vector<16x256xf32>, vector<16x256xf32> -> vector<32x256xf32>
    %c0_11 = arith.constant 0 : index
    %c0_12 = arith.constant 0 : index
    %19 = vector.load %arg5[%c0_11, %c0_12] : memref<256x256xf32, #tpu.memory_space<vmem>>, vector<256x256xf32>
    %cst_13 = arith.constant dense<0.000000e+00> : vector<32x256xf32>
    %20 = tpu.matmul %13, %19, %cst_13 {dimension_numbers = #tpu.dot_dimension_numbers<[1], [0], [0], [1], [0, 0, 1, 1], [], []>} : vector<32x256xf32>, vector<256x256xf32>, vector<32x256xf32> -> vector<32x256xf32>
    %c0_14 = arith.constant 0 : index
    %c0_15 = arith.constant 0 : index
    %21 = vector.load %arg6[%c0_14, %c0_15] : memref<256x256xf32, #tpu.memory_space<vmem>>, vector<256x256xf32>
    %cst_16 = arith.constant dense<0.000000e+00> : vector<32x256xf32>
    %22 = tpu.matmul %18, %21, %cst_16 {dimension_numbers = #tpu.dot_dimension_numbers<[1], [0], [0], [1], [0, 0, 1, 1], [], []>} : vector<32x256xf32>, vector<256x256xf32>, vector<32x256xf32> -> vector<32x256xf32>
    %23 = vector.extract_strided_slice %20 {offsets = [0, 0], sizes = [16, 256], strides = [1, 1]} : vector<32x256xf32> to vector<16x256xf32>
    %24 = vector.extract_strided_slice %22 {offsets = [0, 0], sizes = [16, 256], strides = [1, 1]} : vector<32x256xf32> to vector<16x256xf32>
    %25 = arith.subf %23, %24 : vector<16x256xf32>
    %26 = vector.extract_strided_slice %20 {offsets = [16, 0], sizes = [16, 256], strides = [1, 1]} : vector<32x256xf32> to vector<16x256xf32>
    %27 = vector.extract_strided_slice %22 {offsets = [16, 0], sizes = [16, 256], strides = [1, 1]} : vector<32x256xf32> to vector<16x256xf32>
    %28 = arith.addf %26, %27 : vector<16x256xf32>
    %29 = arith.mulf %25, %25 : vector<16x256xf32>
    %30 = arith.mulf %28, %28 : vector<16x256xf32>
    %31 = arith.addf %29, %30 : vector<16x256xf32>
    %32 = math.sqrt %31 : vector<16x256xf32>
    %33 = arith.mulf %32, %32 : vector<16x256xf32>
    %34 = arith.mulf %25, %25 : vector<16x256xf32>
    %35 = arith.addf %33, %34 : vector<16x256xf32>
    %36 = math.sqrt %35 : vector<16x256xf32>
    %37 = arith.addf %32, %36 : vector<16x256xf32>
    %cst_17 = arith.constant 0.000000e+00 : f32
    %38 = vector.broadcast %cst_17 : f32 to vector<16x256xf32>
    %39 = arith.cmpf ogt, %37, %38 : vector<16x256xf32>
    %cst_18 = arith.constant 1.000000e+00 : f32
    %40 = vector.broadcast %cst_18 : f32 to vector<16x256xf32>
    %41 = arith.select %39, %37, %40 : vector<16x256xi1>, vector<16x256xf32>
    %42 = tpu.reciprocal %41 {approx = true} : vector<16x256xf32> -> vector<16x256xf32>
    %43 = arith.mulf %41, %42 : vector<16x256xf32>
    %cst_19 = arith.constant 2.000000e+00 : f32
    %44 = vector.broadcast %cst_19 : f32 to vector<16x256xf32>
    %45 = arith.subf %44, %43 : vector<16x256xf32>
    %46 = arith.mulf %42, %45 : vector<16x256xf32>
    %cst_20 = arith.constant 0.000000e+00 : f32
    %47 = vector.broadcast %cst_20 : f32 to vector<16x256xf32>
    %48 = arith.cmpf ogt, %37, %47 : vector<16x256xf32>
    %49 = arith.mulf %25, %46 : vector<16x256xf32>
    %cst_21 = arith.constant 0.000000e+00 : f32
    %50 = vector.broadcast %cst_21 : f32 to vector<16x256xf32>
    %51 = arith.select %48, %49, %50 : vector<16x256xi1>, vector<16x256xf32>
    %52 = arith.mulf %51, %51 : vector<16x256xf32>
    %cst_22 = arith.constant 0.0769230798 : f32
    %53 = vector.broadcast %cst_22 : f32 to vector<16x256xf32>
    %54 = arith.mulf %52, %53 : vector<16x256xf32>
    %cst_23 = arith.constant -0.0909090936 : f32
    %55 = vector.broadcast %cst_23 : f32 to vector<16x256xf32>
    %56 = arith.addf %55, %54 : vector<16x256xf32>
    %57 = arith.mulf %52, %56 : vector<16x256xf32>
    %cst_24 = arith.constant 0.111111112 : f32
    %58 = vector.broadcast %cst_24 : f32 to vector<16x256xf32>
    %59 = arith.addf %58, %57 : vector<16x256xf32>
    %60 = arith.mulf %52, %59 : vector<16x256xf32>
    %cst_25 = arith.constant -0.142857149 : f32
    %61 = vector.broadcast %cst_25 : f32 to vector<16x256xf32>
    %62 = arith.addf %61, %60 : vector<16x256xf32>
    %63 = arith.mulf %52, %62 : vector<16x256xf32>
    %cst_26 = arith.constant 2.000000e-01 : f32
    %64 = vector.broadcast %cst_26 : f32 to vector<16x256xf32>
    %65 = arith.addf %64, %63 : vector<16x256xf32>
    %66 = arith.mulf %52, %65 : vector<16x256xf32>
    %cst_27 = arith.constant -0.333333343 : f32
    %67 = vector.broadcast %cst_27 : f32 to vector<16x256xf32>
    %68 = arith.addf %67, %66 : vector<16x256xf32>
    %69 = arith.mulf %52, %68 : vector<16x256xf32>
    %cst_28 = arith.constant 1.000000e+00 : f32
    %70 = vector.broadcast %cst_28 : f32 to vector<16x256xf32>
    %71 = arith.addf %70, %69 : vector<16x256xf32>
    %72 = arith.mulf %51, %71 : vector<16x256xf32>
    %cst_29 = arith.constant 2.000000e+00 : f32
    %73 = vector.broadcast %cst_29 : f32 to vector<16x256xf32>
    %74 = arith.mulf %73, %72 : vector<16x256xf32>
    %75 = vector.extract_strided_slice %74 {offsets = [0, 0], sizes = [8, 256], strides = [1, 1]} : vector<16x256xf32> to vector<8x256xf32>
    %76 = vector.extract_strided_slice %74 {offsets = [8, 0], sizes = [8, 256], strides = [1, 1]} : vector<16x256xf32> to vector<8x256xf32>
    %77 = arith.mulf %75, %76 : vector<8x256xf32>
    %cst_30 = arith.constant 0.000000e+00 : f32
    %78 = vector.broadcast %cst_30 : f32 to vector<8x256xf32>
    %79 = arith.maximumf %77, %78 : vector<8x256xf32>
    %cst_31 = arith.constant 9.99999974E-5 : f32
    %80 = vector.broadcast %cst_31 : f32 to vector<8x256xf32>
    %81 = arith.minimumf %79, %80 : vector<8x256xf32>
    %cst_32 = arith.constant 0.000000e+00 : f32
    %82 = vector.broadcast %cst_32 : f32 to vector<1x1xf32>
    %83 = vector.shape_cast %81 : vector<8x256xf32> to vector<1x8x256xf32>
    %cst_33 = arith.constant dense<0.000000e+00> : vector<1xf32>
    %84 = vector.multi_reduction <add>, %83, %cst_33 [1, 2] : vector<1x8x256xf32> to vector<1xf32>
    %85 = vector.shape_cast %84 : vector<1xf32> to vector<1x1x1xf32>
    %86 = vector.extract %85[0, 0, 0] : f32 from vector<1x1x1xf32>
    %cst_34 = arith.constant 1.000000e+04 : f32
    %87 = arith.mulf %cst_34, %86 : f32
    %88 = vector.broadcast %87 : f32 to vector<1x1xf32>
    %89 = arith.addf %82, %88 : vector<1x1xf32>
    %c0_35 = arith.constant 0 : index
    %c0_36 = arith.constant 0 : index
    %c0_37 = arith.constant 0 : index
    %90 = vector.load %arg8[%c0_35, %c0_36, %c0_37] : memref<1x1x1xf32, #tpu.memory_space<vmem>>, vector<1x1x1xf32>
    %91 = vector.shape_cast %90 : vector<1x1x1xf32> to vector<1x1xf32>
    %92 = vector.shape_cast %89 : vector<1x1xf32> to vector<1x1x1xf32>
    tpu.vector_store %arg8[%c0_35, %c0_36, %c0_37], %92 {strides = array<i32>} : memref<1x1x1xf32, #tpu.memory_space<vmem>>, vector<1x1x1xf32>,
    return
  }
  func.func @transform_0(%arg0: i32) -> (i32, i32) {
    %c0_i32 = arith.constant 0 : i32
    %c0_i32_0 = arith.constant 0 : i32
    return %arg0, %c0_i32 : i32, i32
  }
  func.func @transform_1(%arg0: i32) -> (i32, i32) {
    %c0_i32 = arith.constant 0 : i32
    %c0_i32_0 = arith.constant 0 : i32
    return %arg0, %c0_i32 : i32, i32
  }
  func.func @transform_2(%arg0: i32) -> (i32, i32) {
    %c0_i32 = arith.constant 0 : i32
    %c0_i32_0 = arith.constant 0 : i32
    %c0_i32_1 = arith.constant 0 : i32
    return %c0_i32, %c0_i32_0 : i32, i32
  }
  func.func @transform_3(%arg0: i32) -> (i32, i32) {
    %c0_i32 = arith.constant 0 : i32
    %c0_i32_0 = arith.constant 0 : i32
    %c0_i32_1 = arith.constant 0 : i32
    return %c0_i32, %c0_i32_0 : i32, i32
  }
  func.func @transform_4(%arg0: i32) -> (i32, i32) {
    %c0_i32 = arith.constant 0 : i32
    %c0_i32_0 = arith.constant 0 : i32
    %c0_i32_1 = arith.constant 0 : i32
    return %c0_i32, %c0_i32_0 : i32, i32
  }
  func.func @transform_5(%arg0: i32) -> (i32, i32) {
    %c0_i32 = arith.constant 0 : i32
    %c0_i32_0 = arith.constant 0 : i32
    %c0_i32_1 = arith.constant 0 : i32
    return %c0_i32, %c0_i32_0 : i32, i32
  }
  func.func @transform_6(%arg0: i32) -> (i32, i32) {
    %c0_i32 = arith.constant 0 : i32
    %c0_i32_0 = arith.constant 0 : i32
    %c0_i32_1 = arith.constant 0 : i32
    return %c0_i32, %c0_i32_0 : i32, i32
  }
  func.func @transform_7(%arg0: i32) -> (i32, i32, i32) {
    %c0_i32 = arith.constant 0 : i32
    %c0_i32_0 = arith.constant 0 : i32
    %c0_i32_1 = arith.constant 0 : i32
    return %arg0, %c0_i32, %c0_i32_0 : i32, i32, i32
  }
}

</mosaic_0001>

<bundles_post_ra>
// kernel: fsitm_forward.1
= control target key start
LH: loop header
LB: loop body
LE: loop exit
PB: predicated region body
PF: predicated region fallthrough
CT: control target
= control target key end

     0   :  { %s2106_s0 = inlined_call_operand.vmem [shape: f32[8,256], index: 0, kind: input, shape index: {}]   ;;  %s2107_s1 = inlined_call_operand.vmem [shape: f32[8,256], index: 1, kind: input, shape index: {}]   ;;  %s2108_s2 = inlined_call_operand.vmem [shape: f32[256,256], index: 2, kind: input, shape index: {}]   ;;  %s2109_s3 = inlined_call_operand.vmem [shape: f32[256,256], index: 3, kind: input, shape index: {}]   ;;  %s2110_s4 = inlined_call_operand.vmem [shape: f32[256,256], index: 4, kind: input, shape index: {}]   ;;  %s2111_s5 = inlined_call_operand.vmem [shape: f32[256,256], index: 5, kind: input, shape index: {}]   ;;  %s2112_s6 = inlined_call_operand.vmem [shape: f32[2,256], index: 6, kind: input, shape index: {}]   ;;  %s2113_s7 = inlined_call_operand.hbm [shape: f32[1,1,1], index: 7, kind: output, shape index: {}]  }
   0x1   :  { %v35_v0 = vld [vmem:[%s2108_s2 + $0x8] sm:$0xff]  ;;  %v37_v1 = vld [vmem:[%s2108_s2 + $0x18] sm:$0xff]  ;;  %v34_v2 = vld [vmem:[%s2108_s2] sm:$0xff] }
   0x2   :  { %v876_v3 = vpack.c.bf16 %v37_v1, %v35_v0  ;;  %v36_v4 = vld [vmem:[%s2108_s2 + $0x10] sm:$0xff]  ;;  %v39_v5 = vld [vmem:[%s2108_s2 + $0x28] sm:$0xff]  ;;  %v41_v6 = vld [vmem:[%s2108_s2 + $0x38] sm:$0xff] }
   0x3   :  { %v878_v7 = vpack.c.bf16 %v36_v4, %v34_v2  ;;  %v880_v8 = vpack.c.bf16 %v41_v6, %v39_v5  ;;  %v38_v9 = vld [vmem:[%s2108_s2 + $0x20] sm:$0xff]  ;;  %v40_v10 = vld [vmem:[%s2108_s2 + $0x30] sm:$0xff]  ;;  %v43_v11 = vld [vmem:[%s2108_s2 + $0x48] sm:$0xff] }
   0x4   :  { %877 = vmatprep.subr.bf16.mxu1 %v876_v3  ;;  %v45_v12 = vld [vmem:[%s2108_s2 + $0x58] sm:$0xff]  ;;  %v882_v13 = vpack.c.bf16 %v40_v10, %v38_v9  ;;  %v42_v15 = vld [vmem:[%s2108_s2 + $0x40] sm:$0xff]  ;;  %v44_v16 = vld [vmem:[%s2108_s2 + $0x50] sm:$0xff] }
   0x5   :  { %879 = vmatpush1.bf16.msra.mxu1 %v878_v7  ;;  %v884_v14 = vpack.c.bf16 %v45_v12, %v43_v11  ;;  %v47_v17 = vld [vmem:[%s2108_s2 + $0x68] sm:$0xff]  ;;  %v49_v18 = vld [vmem:[%s2108_s2 + $0x78] sm:$0xff]  ;;  %v886_v19 = vpack.c.bf16 %v44_v16, %v42_v15  ;;  %v46_v21 = vld [vmem:[%s2108_s2 + $0x60] sm:$0xff] }
   0x6   :  { %881 = vmatprep.subr.bf16.mxu1 %v880_v8  ;;  %v888_v20 = vpack.c.bf16 %v49_v18, %v47_v17  ;;  %v48_v22 = vld [vmem:[%s2108_s2 + $0x70] sm:$0xff]  ;;  %v51_v23 = vld [vmem:[%s2108_s2 + $0x88] sm:$0xff]  ;;  %v53_v24 = vld [vmem:[%s2108_s2 + $0x98] sm:$0xff] }
   0x7   :  { %v890_v25 = vpack.c.bf16 %v48_v22, %v46_v21  ;;  %v892_v26 = vpack.c.bf16 %v53_v24, %v51_v23  ;;  %v50_v27 = vld [vmem:[%s2108_s2 + $0x80] sm:$0xff]  ;;  %v52_v28 = vld [vmem:[%s2108_s2 + $0x90] sm:$0xff]  ;;  %v55_v29 = vld [vmem:[%s2108_s2 + $0xa8] sm:$0xff] }
   0x8   :  { %v57_v30 = vld [vmem:[%s2108_s2 + $0xb8] sm:$0xff]  ;;  %v894_v31 = vpack.c.bf16 %v52_v28, %v50_v27  ;;  %v54_v33 = vld [vmem:[%s2108_s2 + $0xa0] sm:$0xff]  ;;  %v56_v34 = vld [vmem:[%s2108_s2 + $0xb0] sm:$0xff] }
   0x9   :  { %883 = vmatpush1.bf16.msra.mxu1 %v882_v13  ;;  %v896_v32 = vpack.c.bf16 %v57_v30, %v55_v29  ;;  %v59_v35 = vld [vmem:[%s2108_s2 + $0xc8] sm:$0xff]  ;;  %v61_v36 = vld [vmem:[%s2108_s2 + $0xd8] sm:$0xff]  ;;  %v898_v37 = vpack.c.bf16 %v56_v34, %v54_v33  ;;  %v58_v39 = vld [vmem:[%s2108_s2 + $0xc0] sm:$0xff] }
   0xa   :  { %885 = vmatprep.subr.bf16.mxu1 %v884_v14  ;;  %v900_v38 = vpack.c.bf16 %v61_v36, %v59_v35  ;;  %v60_v40 = vld [vmem:[%s2108_s2 + $0xd0] sm:$0xff]  ;;  %v1315_v41 = vld [vmem:[%s2107_s1 + $0x8] sm:$0xff]  ;;  %v65_v43 = vld [vmem:[%s2108_s2 + $0xf8] sm:$0xff] }
   0xb   :  { %v63_v42 = vld [vmem:[%s2108_s2 + $0xe8] sm:$0xff]  ;;  %162 = vmatprep.mubr.f32.mxu1 %v1315_v41  ;;  %v902_v44 = vpack.c.bf16 %v60_v40, %v58_v39  ;;  %v62_v46 = vld [vmem:[%s2108_s2 + $0xe0] sm:$0xff]  ;;  %v64_v47 = vld [vmem:[%s2108_s2 + $0xf0] sm:$0xff] }
   0xc   :  { %v904_v45 = vpack.c.bf16 %v65_v43, %v63_v42  ;;  %v67_v48 = vld [vmem:[%s2108_s2 + $0x108] sm:$0xff]  ;;  %v69_v49 = vld [vmem:[%s2108_s2 + $0x118] sm:$0xff]  ;;  %v906_v50 = vpack.c.bf16 %v64_v47, %v62_v46  ;;  %v66_v52 = vld [vmem:[%s2108_s2 + $0x100] sm:$0xff] }
   0xd   :  { %887 = vmatpush1.bf16.msra.mxu1 %v886_v19  ;;  %v908_v51 = vpack.c.bf16 %v69_v49, %v67_v48  ;;  %v68_v53 = vld [vmem:[%s2108_s2 + $0x110] sm:$0xff]  ;;  %v71_v54 = vld [vmem:[%s2108_s2 + $0x128] sm:$0xff]  ;;  %v73_v55 = vld [vmem:[%s2108_s2 + $0x138] sm:$0xff] }
   0xe   :  { %889 = vmatprep.subr.bf16.mxu1 %v888_v20  ;;  %v910_v56 = vpack.c.bf16 %v68_v53, %v66_v52  ;;  %v912_v57 = vpack.c.bf16 %v73_v55, %v71_v54  ;;  %v70_v58 = vld [vmem:[%s2108_s2 + $0x120] sm:$0xff]  ;;  %v72_v59 = vld [vmem:[%s2108_s2 + $0x130] sm:$0xff]  ;;  %v75_v60 = vld [vmem:[%s2108_s2 + $0x148] sm:$0xff] }
   0xf   :  { %v77_v61 = vld [vmem:[%s2108_s2 + $0x158] sm:$0xff]  ;;  %v914_v62 = vpack.c.bf16 %v72_v59, %v70_v58  ;;  %v74_v0 = vld [vmem:[%s2108_s2 + $0x140] sm:$0xff]  ;;  %v76_v1 = vld [vmem:[%s2108_s2 + $0x150] sm:$0xff] }
  0x10   :  { %v916_v63 = vpack.c.bf16 %v77_v61, %v75_v60  ;;  %v79_v2 = vld [vmem:[%s2108_s2 + $0x168] sm:$0xff]  ;;  %v81_v3 = vld [vmem:[%s2108_s2 + $0x178] sm:$0xff]  ;;  %v918_v4 = vpack.c.bf16 %v76_v1, %v74_v0  ;;  %v78_v6 = vld [vmem:[%s2108_s2 + $0x160] sm:$0xff] }
  0x11   :  { %891 = vmatpush1.bf16.msra.mxu1 %v890_v25  ;;  %v920_v5 = vpack.c.bf16 %v81_v3, %v79_v2  ;;  %v80_v7 = vld [vmem:[%s2108_s2 + $0x170] sm:$0xff]  ;;  %v83_v8 = vld [vmem:[%s2108_s2 + $0x188] sm:$0xff]  ;;  %v85_v9 = vld [vmem:[%s2108_s2 + $0x198] sm:$0xff] }
  0x12   :  { %893 = vmatprep.subr.bf16.mxu1 %v892_v26  ;;  %v82_v10 = vld [vmem:[%s2108_s2 + $0x180] sm:$0xff]  ;;  %v84_v11 = vld [vmem:[%s2108_s2 + $0x190] sm:$0xff]  ;;  %v922_v12 = vpack.c.bf16 %v80_v7, %v78_v6  ;;  %v87_v13 = vld [vmem:[%s2108_s2 + $0x1a8] sm:$0xff]  ;;  %v924_v18 = vpack.c.bf16 %v85_v9, %v83_v8 }
  0x13   :  { %v89_v14 = vld [vmem:[%s2108_s2 + $0x1b8] sm:$0xff]  ;;  %v355_v15 = vld [vmem:[%s2110_s4 + $0x8] sm:$0xff]  ;;  %v354_v17 = vld [vmem:[%s2110_s4] sm:$0xff]  ;;  %v926_v29 = vpack.c.bf16 %v84_v11, %v82_v10 }
  0x14   :  { %v357_v16 = vld [vmem:[%s2110_s4 + $0x18] sm:$0xff]  ;;  %v356_v20 = vld [vmem:[%s2110_s4 + $0x10] sm:$0xff]  ;;  %v359_v21 = vld [vmem:[%s2110_s4 + $0x28] sm:$0xff]  ;;  %v928_v33 = vpack.c.bf16 %v89_v14, %v87_v13 }
  0x15   :  { %895 = vmatpush1.bf16.msra.mxu1 %v894_v31  ;;  %v1004_v19 = vpack.c.bf16 %v357_v16, %v355_v15  ;;  %v361_v22 = vld [vmem:[%s2110_s4 + $0x38] sm:$0xff]  ;;  %v1006_v23 = vpack.c.bf16 %v356_v20, %v354_v17  ;;  %v358_v25 = vld [vmem:[%s2110_s4 + $0x20] sm:$0xff]  ;;  %v360_v26 = vld [vmem:[%s2110_s4 + $0x30] sm:$0xff] }
  0x16   :  { %897 = vmatprep.subr.bf16.mxu1 %v896_v32  ;;  %v1008_v24 = vpack.c.bf16 %v361_v22, %v359_v21  ;;  %v363_v27 = vld [vmem:[%s2110_s4 + $0x48] sm:$0xff]  ;;  %v365_v28 = vld [vmem:[%s2110_s4 + $0x58] sm:$0xff]  ;;  %v86_v30 = vld [vmem:[%s2108_s2 + $0x1a0] sm:$0xff]  ;;  %v1010_v32 = vpack.c.bf16 %v360_v26, %v358_v25 }
  0x17   :  { %1005 = vmatprep.subr.bf16.mxu0 %v1004_v19  ;;  %v88_v31 = vld [vmem:[%s2108_s2 + $0x1b0] sm:$0xff]  ;;  %v91_v34 = vld [vmem:[%s2108_s2 + $0x1c8] sm:$0xff]  ;;  %v1012_v35 = vpack.c.bf16 %v365_v28, %v363_v27  ;;  %v362_v36 = vld [vmem:[%s2110_s4 + $0x40] sm:$0xff] }
  0x18   :  { %1007 = vmatpush1.bf16.msra.mxu0 %v1006_v23  ;;  %v367_v39 = vld [vmem:[%s2110_s4 + $0x68] sm:$0xff]  ;;  %v369_v40 = vld [vmem:[%s2110_s4 + $0x78] sm:$0xff]  ;;  %v930_v42 = vpack.c.bf16 %v88_v31, %v86_v30  ;;  %v90_v43 = vld [vmem:[%s2108_s2 + $0x1c0] sm:$0xff] }
  0x19   :  { %899 = vmatpush1.bf16.msra.mxu1 %v898_v37  ;;  %1009 = vmatprep.subr.bf16.mxu0 %v1008_v24  ;;  %v364_v37 = vld [vmem:[%s2110_s4 + $0x50] sm:$0xff]  ;;  %v95_v47 = vld [vmem:[%s2108_s2 + $0x1e8] sm:$0xff]  ;;  %v1016_v48 = vpack.c.bf16 %v369_v40, %v367_v39  ;;  %v366_v49 = vld [vmem:[%s2110_s4 + $0x60] sm:$0xff] }
  0x1a   :  { %901 = vmatprep.subr.bf16.mxu1 %v900_v38  ;;  %v93_v38 = vld [vmem:[%s2108_s2 + $0x1d8] sm:$0xff]  ;;  %v371_v52 = vld [vmem:[%s2110_s4 + $0x88] sm:$0xff]  ;;  %v94_v55 = vld [vmem:[%s2108_s2 + $0x1e0] sm:$0xff] }
  0x1b   :  { %v932_v46 = vpack.c.bf16 %v93_v38, %v91_v34  ;;  %v373_v53 = vld [vmem:[%s2110_s4 + $0x98] sm:$0xff]  ;;  %v176_v59 = vld [vmem:[%s2109_s3 + $0x8] sm:$0xff]  ;;  %v370_v61 = vld [vmem:[%s2110_s4 + $0x80] sm:$0xff] }
  0x1c   :  { %1011 = vmatpush1.bf16.msra.mxu0 %v1010_v32  ;;  %v1020_v60 = vpack.c.bf16 %v373_v53, %v371_v52  ;;  %v375_v0 = vld [vmem:[%s2110_s4 + $0xa8] sm:$0xff]  ;;  %v377_v1 = vld [vmem:[%s2110_s4 + $0xb8] sm:$0xff]  ;;  %v177_v6 = vld [vmem:[%s2109_s3 + $0x10] sm:$0xff] }
  0x1d   :  { %903 = vmatpush1.bf16.msra.mxu1 %v902_v44  ;;  %v92_v44 = vld [vmem:[%s2108_s2 + $0x1d0] sm:$0xff]  ;;  %1013 = vmatprep.subr.bf16.mxu0 %v1012_v35  ;;  %v180_v7 = vld [vmem:[%s2109_s3 + $0x28] sm:$0xff]  ;;  %v1024_v8 = vpack.c.bf16 %v377_v1, %v375_v0  ;;  %v182_v9 = vld [vmem:[%s2109_s3 + $0x38] sm:$0xff] }
  0x1e   :  { %905 = vmatprep.subr.bf16.mxu1 %v904_v45  ;;  %v1014_v45 = vpack.c.bf16 %v364_v37, %v362_v36  ;;  %v934_v54 = vpack.c.bf16 %v92_v44, %v90_v43  ;;  %v374_v10 = vld [vmem:[%s2110_s4 + $0xa0] sm:$0xff]  ;;  %v376_v11 = vld [vmem:[%s2110_s4 + $0xb0] sm:$0xff]  ;;  %v381_v13 = vld [vmem:[%s2110_s4 + $0xd8] sm:$0xff] }
  0x1f   :  { %v1525_v14 = vld [vmem:[%s2107_s1] sm:$0xff]  ;;  %v181_v17 = vld [vmem:[%s2109_s3 + $0x30] sm:$0xff]  ;;  %v184_v19 = vld [vmem:[%s2109_s3 + $0x48] sm:$0xff]  ;;  %v1026_v21 = vpack.c.bf16 %v376_v11, %v374_v10 }
  0x20   :  { %1015 = vmatpush1.bf16.msra.mxu0 %v1014_v45  ;;  %v179_v16 = vld [vmem:[%s2109_s3 + $0x20] sm:$0xff]  ;;  %v1539_v20 = vld [vmem:[%s2106_s0 + $0x8] sm:$0xff] }
  0x21   :  { %907 = vmatpush1.bf16.msra.mxu1 %v906_v50  ;;  %v368_v50 = vld [vmem:[%s2110_s4 + $0x70] sm:$0xff]  ;;  %1017 = vmatprep.subr.bf16.mxu0 %v1016_v48 }
  0x22   :  { %909 = vmatprep.subr.bf16.mxu1 %v908_v51  ;;  %v97_v51 = vld [vmem:[%s2108_s2 + $0x1f8] sm:$0xff] }
  0x23   :  { %v936_v58 = vpack.c.bf16 %v97_v51, %v95_v47 }
  0x25   :  { %911 = vmatpush1.bf16.msra.mxu1 %v910_v56  ;;  %v96_v56 = vld [vmem:[%s2108_s2 + $0x1f0] sm:$0xff] }
  0x26   :  { %913 = vmatprep.subr.bf16.mxu1 %v912_v57  ;;  %v1018_v57 = vpack.c.bf16 %v368_v50, %v366_v49  ;;  %v938_v2 = vpack.c.bf16 %v96_v56, %v94_v55 }
  0x28   :  { %1019 = vmatpush1.bf16.msra.mxu0 %v1018_v57 }
  0x29   :  { %915 = vmatpush1.bf16.msra.mxu1 %v914_v62  ;;  %v372_v62 = vld [vmem:[%s2110_s4 + $0x90] sm:$0xff]  ;;  %1021 = vmatprep.subr.bf16.mxu0 %v1020_v60 }
  0x2a   :  { %917 = vmatprep.subr.bf16.mxu1 %v916_v63  ;;  %v178_v63 = vld [vmem:[%s2109_s3 + $0x18] sm:$0xff]  ;;  %v1022_v3 = vpack.c.bf16 %v372_v62, %v370_v61 }
  0x2c   :  { %1023 = vmatpush1.bf16.msra.mxu0 %v1022_v3 }
  0x2d   :  { %919 = vmatpush1.bf16.msra.mxu1 %v918_v4  ;;  %v940_v4 = vpack.c.bf16 %v178_v63, %v176_v59  ;;  %1025 = vmatprep.subr.bf16.mxu0 %v1024_v8 }
  0x2e   :  { %921 = vmatprep.subr.bf16.mxu1 %v920_v5  ;;  %v175_v5 = vld [vmem:[%s2109_s3] sm:$0xff] }
  0x2f   :  { %v942_v15 = vpack.c.bf16 %v177_v6, %v175_v5 }
  0x31   :  { %923 = vmatpush1.bf16.msra.mxu1 %v922_v12  ;;  %v379_v12 = vld [vmem:[%s2110_s4 + $0xc8] sm:$0xff] }
  0x32   :  { %925 = vmatprep.subr.bf16.mxu1 %v924_v18  ;;  %v944_v18 = vpack.c.bf16 %v182_v9, %v180_v7 }
  0x35   :  { %927 = vmatpush1.bf16.msra.mxu1 %v926_v29 }
  0x36   :  { %929 = vmatprep.subr.bf16.mxu1 %v928_v33 }
  0x39   :  { %931 = vmatpush1.bf16.msra.mxu1 %v930_v42 }
  0x3a   :  { %933 = vmatprep.subr.bf16.mxu1 %v932_v46 }
  0x3d   :  { %935 = vmatpush1.bf16.msra.mxu1 %v934_v54 }
  0x3e   :  { %937 = vmatprep.subr.bf16.mxu1 %v936_v58 }
  0x41   :  { %939 = vmatpush1.bf16.msra.mxu1 %v938_v2 }
  0x42   :  { %941 = vmatprep.subr.bf16.mxu1 %v940_v4 }
  0x43   :  { %12 = vsyncpa [#allocation3], 0  ;;  %v186_v22 = vld [vmem:[%s2109_s3 + $0x58] sm:$0xff]  ;;  %v1028_v23 = vpack.c.bf16 %v381_v13, %v379_v12  ;;  %v378_v24 = vld [vmem:[%s2110_s4 + $0xc0] sm:$0xff]  ;;  %v946_v28 = vpack.c.bf16 %v181_v17, %v179_v16  ;;  %1027 = vmatpush1.bf16.msra.mxu0 %v1026_v21 }
  0x44   :  { %v380_v25 = vld [vmem:[%s2110_s4 + $0xd0] sm:$0xff]  ;;  %163 = vmatmul.mubr.f32.vlgmr.msra.gmra.mrb[0].mxu1 %v1525_v14  ;;  %v383_v26 = vld [vmem:[%s2110_s4 + $0xe8] sm:$0xff]  ;;  %v385_v27 = vld [vmem:[%s2110_s4 + $0xf8] sm:$0xff]  ;;  %v948_v30 = vpack.c.bf16 %v186_v22, %v184_v19 }
  0x45   :  { %943 = vmatpush1.bf16.msra.mxu1 %v942_v15  ;;  %168 = vmatprep.mubr.f32.mxu1 %v1539_v20  ;;  %v1561_v29 = vld [vmem:[%s2106_s0] sm:$0xff]  ;;  %v185_v32 = vld [vmem:[%s2109_s3 + $0x50] sm:$0xff]  ;;  %v188_v33 = vld [vmem:[%s2109_s3 + $0x68] sm:$0xff]  ;;  %v1030_v34 = vpack.c.bf16 %v380_v25, %v378_v24  ;;  %v1032_v36 = vpack.c.bf16 %v385_v27, %v383_v26 }
  0x46   :  { %945 = vmatprep.subr.bf16.mxu1 %v944_v18  ;;  %v183_v31 = vld [vmem:[%s2109_s3 + $0x40] sm:$0xff]  ;;  %v190_v35 = vld [vmem:[%s2109_s3 + $0x78] sm:$0xff]  ;;  %1029 = vmatprep.subr.bf16.mxu0 %v1028_v23  ;;  %v384_v38 = vld [vmem:[%s2110_s4 + $0xf0] sm:$0xff] }
  0x47   :  { %v382_v37 = vld [vmem:[%s2110_s4 + $0xe0] sm:$0xff]  ;;  %v387_v39 = vld [vmem:[%s2110_s4 + $0x108] sm:$0xff]  ;;  %v389_v40 = vld [vmem:[%s2110_s4 + $0x118] sm:$0xff]  ;;  %v950_v42 = vpack.c.bf16 %v185_v32, %v183_v31  ;;  %v952_v43 = vpack.c.bf16 %v190_v35, %v188_v33  ;;  %1031 = vmatpush1.bf16.msra.mxu0 %v1030_v34 }
  0x48   :  { %169 = vmatmul.mubr.f32.gmra.mrb[2].mxu1 %v1561_v29  ;;  %v187_v44 = vld [vmem:[%s2109_s3 + $0x60] sm:$0xff]  ;;  %v189_v45 = vld [vmem:[%s2109_s3 + $0x70] sm:$0xff]  ;;  %v192_v46 = vld [vmem:[%s2109_s3 + $0x88] sm:$0xff]  ;;  %v1034_v47 = vpack.c.bf16 %v384_v38, %v382_v37  ;;  %1033 = vmatprep.subr.bf16.mxu0 %v1032_v36  ;;  %v1036_v48 = vpack.c.bf16 %v389_v40, %v387_v39 }
  0x49   :  { %947 = vmatpush1.bf16.msra.mxu1 %v946_v28  ;;  %303 = vmatprep.mubr.f32.mxu1 %v1315_v41  ;;  %v194_v41 = vld [vmem:[%s2109_s3 + $0x98] sm:$0xff]  ;;  %v386_v49 = vld [vmem:[%s2110_s4 + $0x100] sm:$0xff]  ;;  %v388_v50 = vld [vmem:[%s2110_s4 + $0x110] sm:$0xff]  ;;  %v954_v53 = vpack.c.bf16 %v189_v45, %v187_v44 }
  0x4a   :  { %949 = vmatprep.subr.bf16.mxu1 %v948_v30  ;;  %v391_v51 = vld [vmem:[%s2110_s4 + $0x128] sm:$0xff]  ;;  %v393_v52 = vld [vmem:[%s2110_s4 + $0x138] sm:$0xff]  ;;  %v956_v54 = vpack.c.bf16 %v194_v41, %v192_v46  ;;  %v191_v55 = vld [vmem:[%s2109_s3 + $0x80] sm:$0xff]  ;;  %v1038_v58 = vpack.c.bf16 %v388_v50, %v386_v49 }
  0x4b   :  { %v193_v56 = vld [vmem:[%s2109_s3 + $0x90] sm:$0xff]  ;;  %v196_v57 = vld [vmem:[%s2109_s3 + $0xa8] sm:$0xff]  ;;  %1035 = vmatpush1.bf16.msra.mxu0 %v1034_v47  ;;  %v198_v59 = vld [vmem:[%s2109_s3 + $0xb8] sm:$0xff]  ;;  %v1040_v60 = vpack.c.bf16 %v393_v52, %v391_v51 }
  0x4c   :  { %1037 = vmatprep.subr.bf16.mxu0 %v1036_v48  ;;  %v390_v61 = vld [vmem:[%s2110_s4 + $0x120] sm:$0xff]  ;;  %v392_v62 = vld [vmem:[%s2110_s4 + $0x130] sm:$0xff]  ;;  %v395_v63 = vld [vmem:[%s2110_s4 + $0x148] sm:$0xff]  ;;  %v958_v1 = vpack.c.bf16 %v193_v56, %v191_v55  ;;  %v960_v2 = vpack.c.bf16 %v198_v59, %v196_v57 }
  0x4d   :  { %951 = vmatpush1.bf16.msra.mxu1 %v950_v42  ;;  %v397_v0 = vld [vmem:[%s2110_s4 + $0x158] sm:$0xff]  ;;  %v195_v3 = vld [vmem:[%s2109_s3 + $0xa0] sm:$0xff]  ;;  %v197_v4 = vld [vmem:[%s2109_s3 + $0xb0] sm:$0xff]  ;;  %v1042_v6 = vpack.c.bf16 %v392_v62, %v390_v61 }
  0x4e   :  { %953 = vmatprep.subr.bf16.mxu1 %v952_v43  ;;  %v200_v5 = vld [vmem:[%s2109_s3 + $0xc8] sm:$0xff]  ;;  %v202_v7 = vld [vmem:[%s2109_s3 + $0xd8] sm:$0xff]  ;;  %v1044_v8 = vpack.c.bf16 %v397_v0, %v395_v63  ;;  %v394_v9 = vld [vmem:[%s2110_s4 + $0x140] sm:$0xff]  ;;  %v962_v13 = vpack.c.bf16 %v197_v4, %v195_v3 }
  0x4f   :  { %1039 = vmatpush1.bf16.msra.mxu0 %v1038_v58  ;;  %v396_v10 = vld [vmem:[%s2110_s4 + $0x150] sm:$0xff]  ;;  %v399_v11 = vld [vmem:[%s2110_s4 + $0x168] sm:$0xff]  ;;  %v401_v12 = vld [vmem:[%s2110_s4 + $0x178] sm:$0xff]  ;;  %v964_v15 = vpack.c.bf16 %v202_v7, %v200_v5 }
  0x50   :  { %1041 = vmatprep.subr.bf16.mxu0 %v1040_v60  ;;  %v199_v16 = vld [vmem:[%s2109_s3 + $0xc0] sm:$0xff]  ;;  %v201_v17 = vld [vmem:[%s2109_s3 + $0xd0] sm:$0xff]  ;;  %v204_v18 = vld [vmem:[%s2109_s3 + $0xe8] sm:$0xff]  ;;  %v1046_v19 = vpack.c.bf16 %v396_v10, %v394_v9  ;;  %v1048_v22 = vpack.c.bf16 %v401_v12, %v399_v11 }
  0x51   :  { %955 = vmatpush1.bf16.msra.mxu1 %v954_v53  ;;  %v206_v21 = vld [vmem:[%s2109_s3 + $0xf8] sm:$0xff]  ;;  %v398_v23 = vld [vmem:[%s2110_s4 + $0x160] sm:$0xff]  ;;  %v400_v24 = vld [vmem:[%s2110_s4 + $0x170] sm:$0xff]  ;;  %v966_v27 = vpack.c.bf16 %v201_v17, %v199_v16 }
  0x52   :  { %957 = vmatprep.subr.bf16.mxu1 %v956_v54  ;;  %v403_v25 = vld [vmem:[%s2110_s4 + $0x188] sm:$0xff]  ;;  %v405_v26 = vld [vmem:[%s2110_s4 + $0x198] sm:$0xff]  ;;  %v968_v28 = vpack.c.bf16 %v206_v21, %v204_v18  ;;  %v203_v30 = vld [vmem:[%s2109_s3 + $0xe0] sm:$0xff]  ;;  %v1050_v33 = vpack.c.bf16 %v400_v24, %v398_v23 }
  0x53   :  { %1043 = vmatpush1.bf16.msra.mxu0 %v1042_v6  ;;  %v205_v31 = vld [vmem:[%s2109_s3 + $0xf0] sm:$0xff]  ;;  %v208_v32 = vld [vmem:[%s2109_s3 + $0x108] sm:$0xff]  ;;  %v210_v34 = vld [vmem:[%s2109_s3 + $0x118] sm:$0xff]  ;;  %v1052_v35 = vpack.c.bf16 %v405_v26, %v403_v25 }
  0x54   :  { %1045 = vmatprep.subr.bf16.mxu0 %v1044_v8  ;;  %v402_v36 = vld [vmem:[%s2110_s4 + $0x180] sm:$0xff]  ;;  %v404_v37 = vld [vmem:[%s2110_s4 + $0x190] sm:$0xff]  ;;  %v407_v38 = vld [vmem:[%s2110_s4 + $0x1a8] sm:$0xff]  ;;  %v970_v40 = vpack.c.bf16 %v205_v31, %v203_v30  ;;  %v972_v42 = vpack.c.bf16 %v210_v34, %v208_v32 }
  0x55   :  { %959 = vmatpush1.bf16.msra.mxu1 %v958_v1  ;;  %v409_v39 = vld [vmem:[%s2110_s4 + $0x1b8] sm:$0xff]  ;;  %v207_v43 = vld [vmem:[%s2109_s3 + $0x100] sm:$0xff]  ;;  %v209_v44 = vld [vmem:[%s2109_s3 + $0x110] sm:$0xff]  ;;  %v1054_v46 = vpack.c.bf16 %v404_v37, %v402_v36 }
  0x56   :  { %961 = vmatprep.subr.bf16.mxu1 %v960_v2  ;;  %v212_v45 = vld [vmem:[%s2109_s3 + $0x128] sm:$0xff]  ;;  %v214_v47 = vld [vmem:[%s2109_s3 + $0x138] sm:$0xff]  ;;  %v1056_v41 = vpack.c.bf16 %v409_v39, %v407_v38  ;;  %v406_v48 = vld [vmem:[%s2110_s4 + $0x1a0] sm:$0xff]  ;;  %v974_v52 = vpack.c.bf16 %v209_v44, %v207_v43  ;;  %v317_v44 = vlaneseq }
  0x57   :  { %1047 = vmatpush1.bf16.msra.mxu0 %v1046_v19  ;;  %v408_v49 = vld [vmem:[%s2110_s4 + $0x1b0] sm:$0xff]  ;;  %v411_v50 = vld [vmem:[%s2110_s4 + $0x1c8] sm:$0xff]  ;;  %v413_v51 = vld [vmem:[%s2110_s4 + $0x1d8] sm:$0xff]  ;;  %v976_v53 = vpack.c.bf16 %v214_v47, %v212_v45 }
  0x58   :  { %1049 = vmatprep.subr.bf16.mxu0 %v1048_v22  ;;  %v211_v54 = vld [vmem:[%s2109_s3 + $0x120] sm:$0xff]  ;;  %v213_v55 = vld [vmem:[%s2109_s3 + $0x130] sm:$0xff]  ;;  %v216_v56 = vld [vmem:[%s2109_s3 + $0x148] sm:$0xff]  ;;  %v1058_v57 = vpack.c.bf16 %v408_v49, %v406_v48  ;;  %v1060_v59 = vpack.c.bf16 %v413_v51, %v411_v50  ;;  %v318_v45 = vshrl.u32 %v317_v44, 7 }
  0x59   :  { %963 = vmatpush1.bf16.msra.mxu1 %v962_v13  ;;  %v218_v58 = vld [vmem:[%s2109_s3 + $0x158] sm:$0xff]  ;;  %v410_v60 = vld [vmem:[%s2110_s4 + $0x1c0] sm:$0xff]  ;;  %v412_v61 = vld [vmem:[%s2110_s4 + $0x1d0] sm:$0xff]  ;;  %v978_v62 = vpack.c.bf16 %v213_v55, %v211_v54 }
  0x5a   :  { %965 = vmatprep.subr.bf16.mxu1 %v964_v15  ;;  %v980_v63 = vpack.c.bf16 %v218_v58, %v216_v56  ;;  %v215_v0 = vld [vmem:[%s2109_s3 + $0x140] sm:$0xff]  ;;  %v217_v1 = vld [vmem:[%s2109_s3 + $0x150] sm:$0xff]  ;;  %v1062_v2 = vpack.c.bf16 %v412_v61, %v410_v60  ;;  %v220_v3 = vld [vmem:[%s2109_s3 + $0x168] sm:$0xff]  ;;  %v319_v47 = vsub.s32 0, %v318_v45  ;;  %v323_v48 = vsub.s32 1, %v318_v45 }
  0x5b   :  { %1051 = vmatpush1.bf16.msra.mxu0 %v1050_v33  ;;  %v222_v4 = vld [vmem:[%s2109_s3 + $0x178] sm:$0xff]  ;;  %v982_v5 = vpack.c.bf16 %v217_v1, %v215_v0  ;;  %v219_v7 = vld [vmem:[%s2109_s3 + $0x160] sm:$0xff]  ;;  %v221_v8 = vld [vmem:[%s2109_s3 + $0x170] sm:$0xff] }
  0x5c   :  { %1053 = vmatprep.subr.bf16.mxu0 %v1052_v35  ;;  %v984_v6 = vpack.c.bf16 %v222_v4, %v220_v3  ;;  %v224_v9 = vld [vmem:[%s2109_s3 + $0x188] sm:$0xff]  ;;  %v226_v10 = vld [vmem:[%s2109_s3 + $0x198] sm:$0xff]  ;;  %v986_v11 = vpack.c.bf16 %v221_v8, %v219_v7  ;;  %v223_v13 = vld [vmem:[%s2109_s3 + $0x180] sm:$0xff] }
  0x5d   :  { %967 = vmatpush1.bf16.msra.mxu1 %v966_v27  ;;  %v988_v12 = vpack.c.bf16 %v226_v10, %v224_v9  ;;  %v225_v15 = vld [vmem:[%s2109_s3 + $0x190] sm:$0xff]  ;;  %v228_v16 = vld [vmem:[%s2109_s3 + $0x1a8] sm:$0xff]  ;;  %v230_v17 = vld [vmem:[%s2109_s3 + $0x1b8] sm:$0xff] }
  0x5e   :  { %969 = vmatprep.subr.bf16.mxu1 %v968_v28  ;;  %v990_v18 = vpack.c.bf16 %v225_v15, %v223_v13  ;;  %v992_v19 = vpack.c.bf16 %v230_v17, %v228_v16  ;;  %v227_v21 = vld [vmem:[%s2109_s3 + $0x1a0] sm:$0xff]  ;;  %v229_v22 = vld [vmem:[%s2109_s3 + $0x1b0] sm:$0xff]  ;;  %v232_v23 = vld [vmem:[%s2109_s3 + $0x1c8] sm:$0xff] }
  0x5f   :  { %1055 = vmatpush1.bf16.msra.mxu0 %v1054_v46  ;;  %v234_v24 = vld [vmem:[%s2109_s3 + $0x1d8] sm:$0xff]  ;;  %v994_v25 = vpack.c.bf16 %v229_v22, %v227_v21  ;;  %v231_v27 = vld [vmem:[%s2109_s3 + $0x1c0] sm:$0xff]  ;;  %v233_v28 = vld [vmem:[%s2109_s3 + $0x1d0] sm:$0xff] }
  0x60   :  { %1057 = vmatprep.subr.bf16.mxu0 %v1056_v41  ;;  %v996_v26 = vpack.c.bf16 %v234_v24, %v232_v23  ;;  %v236_v30 = vld [vmem:[%s2109_s3 + $0x1e8] sm:$0xff]  ;;  %v238_v31 = vld [vmem:[%s2109_s3 + $0x1f8] sm:$0xff]  ;;  %v998_v32 = vpack.c.bf16 %v233_v28, %v231_v27  ;;  %v235_v34 = vld [vmem:[%s2109_s3 + $0x1e0] sm:$0xff] }
  0x61   :  { %971 = vmatpush1.bf16.msra.mxu1 %v970_v40  ;;  %v1000_v33 = vpack.c.bf16 %v238_v31, %v236_v30  ;;  %v237_v35 = vld [vmem:[%s2109_s3 + $0x1f0] sm:$0xff]  ;;  %v415_v37 = vld [vmem:[%s2110_s4 + $0x1e8] sm:$0xff]  ;;  %v417_v38 = vld [vmem:[%s2110_s4 + $0x1f8] sm:$0xff] }
  0x62   :  { %973 = vmatprep.subr.bf16.mxu1 %v972_v42  ;;  %v1002_v36 = vpack.c.bf16 %v237_v35, %v235_v34  ;;  %v1064_v39 = vpack.c.bf16 %v417_v38, %v415_v37  ;;  %v414_v40 = vld [vmem:[%s2110_s4 + $0x1e0] sm:$0xff]  ;;  %v510_v42 = vld [vmem:[%s2111_s5 + $0x18] sm:$0xff]  ;;  %v509_v54 = vld [vmem:[%s2111_s5 + $0x10] sm:$0xff] }
  0x63   :  { %1059 = vmatpush1.bf16.msra.mxu0 %v1058_v57  ;;  %v27_v46 = vld [vmem:[%s2112_s6] ss:$2 sm:$0x3]  ;;  %v875_v41 = vld [vmem:[%s2112_s6 + $0x1] ss:$2 sm:$0x3] }
  0x64   :  { %1061 = vmatprep.subr.bf16.mxu0 %v1060_v59  ;;  %v1844_v49 = vrot.slane %v27_v46, %v319_v47  ;;  %v1846_v50 = vrot.slane %v875_v41, %v319_v47  ;;  %v1848_v51 = vrot.slane %v875_v41, %v323_v48  ;;  %v512_v56 = vld [vmem:[%s2111_s5 + $0x28] sm:$0xff]  ;;  %v514_v57 = vld [vmem:[%s2111_s5 + $0x38] sm:$0xff]  ;;  %v511_v1 = vld [vmem:[%s2111_s5 + $0x20] sm:$0xff] }
  0x65   :  { %975 = vmatpush1.bf16.msra.mxu1 %v974_v52  ;;  %v1850_v52 = vrot.slane %v27_v46, %v323_v48  ;;  %v1072_v0 = vpack.c.bf16 %v514_v57, %v512_v56  ;;  %v516_v3 = vld [vmem:[%s2111_s5 + $0x48] sm:$0xff]  ;;  %v518_v4 = vld [vmem:[%s2111_s5 + $0x58] sm:$0xff]  ;;  %v515_v13 = vld [vmem:[%s2111_s5 + $0x40] sm:$0xff] }
  0x66   :  { %977 = vmatprep.subr.bf16.mxu1 %v976_v53  ;;  %v507_v53 = vld [vmem:[%s2111_s5] sm:$0xff]  ;;  %v517_v15 = vld [vmem:[%s2111_s5 + $0x50] sm:$0xff]  ;;  %v520_v16 = vld [vmem:[%s2111_s5 + $0x68] sm:$0xff] }
  0x67   :  { %1063 = vmatpush1.bf16.msra.mxu0 %v1062_v2  ;;  %v513_v2 = vld [vmem:[%s2111_s5 + $0x30] sm:$0xff]  ;;  %v522_v17 = vld [vmem:[%s2111_s5 + $0x78] sm:$0xff]  ;;  %v519_v21 = vld [vmem:[%s2111_s5 + $0x60] sm:$0xff] }
  0x68   :  { %1065 = vmatprep.subr.bf16.mxu0 %v1064_v39  ;;  %v1074_v9 = vpack.c.bf16 %v513_v2, %v511_v1  ;;  %v521_v22 = vld [vmem:[%s2111_s5 + $0x70] sm:$0xff]  ;;  %v524_v23 = vld [vmem:[%s2111_s5 + $0x88] sm:$0xff]  ;;  %v526_v24 = vld [vmem:[%s2111_s5 + $0x98] sm:$0xff] }
  0x69   :  { %979 = vmatpush1.bf16.msra.mxu1 %v978_v62  ;;  %v523_v27 = vld [vmem:[%s2111_s5 + $0x80] sm:$0xff]  ;;  %v525_v28 = vld [vmem:[%s2111_s5 + $0x90] sm:$0xff]  ;;  %v528_v30 = vld [vmem:[%s2111_s5 + $0xa8] sm:$0xff] }
  0x6a   :  { %981 = vmatprep.subr.bf16.mxu1 %v980_v63  ;;  %v1070_v63 = vpack.c.bf16 %v509_v54, %v507_v53  ;;  %v530_v31 = vld [vmem:[%s2111_s5 + $0xb8] sm:$0xff]  ;;  %v527_v34 = vld [vmem:[%s2111_s5 + $0xa0] sm:$0xff]  ;;  %v529_v35 = vld [vmem:[%s2111_s5 + $0xb0] sm:$0xff] }
  0x6b   :  { %v534_v37 = vld [vmem:[%s2111_s5 + $0xd8] sm:$0xff]  ;;  %v1090_v38 = vpack.c.bf16 %v529_v35, %v527_v34  ;;  %v535_v44 = vld [vmem:[%s2111_s5 + $0xe0] sm:$0xff]  ;;  %v537_v45 = vld [vmem:[%s2111_s5 + $0xf0] sm:$0xff] }
  0x6c   :  { %v540_v46 = vld [vmem:[%s2111_s5 + $0x108] sm:$0xff]  ;;  %v542_v47 = vld [vmem:[%s2111_s5 + $0x118] sm:$0xff]  ;;  %v1098_v41 = vpack.c.bf16 %v537_v45, %v535_v44  ;;  %v539_v53 = vld [vmem:[%s2111_s5 + $0x100] sm:$0xff] }
  0x6d   :  { %983 = vmatpush1.bf16.msra.mxu1 %v982_v5  ;;  %v1100_v48 = vpack.c.bf16 %v542_v47, %v540_v46  ;;  %v541_v54 = vld [vmem:[%s2111_s5 + $0x110] sm:$0xff]  ;;  %v546_v56 = vld [vmem:[%s2111_s5 + $0x138] sm:$0xff]  ;;  %v568_v34 = vld [vmem:[%s2111_s5 + $0x1e8] sm:$0xff] }
  0x6e   :  { %985 = vmatprep.subr.bf16.mxu1 %v984_v6  ;;  %v1102_v57 = vpack.c.bf16 %v541_v54, %v539_v53  ;;  %v570_v35 = vld [vmem:[%s2111_s5 + $0x1f8] sm:$0xff] }
  0x71   :  { %987 = vmatpush1.bf16.msra.mxu1 %v986_v11 }
  0x72   :  { %989 = vmatprep.subr.bf16.mxu1 %v988_v12  ;;  %v1076_v12 = vpack.c.bf16 %v518_v4, %v516_v3  ;;  %v547_v3 = vld [vmem:[%s2111_s5 + $0x140] sm:$0xff]  ;;  %v549_v4 = vld [vmem:[%s2111_s5 + $0x150] sm:$0xff] }
  0x75   :  { %991 = vmatpush1.bf16.msra.mxu1 %v990_v18  ;;  %v1078_v18 = vpack.c.bf16 %v517_v15, %v515_v13  ;;  %v556_v13 = vld [vmem:[%s2111_s5 + $0x188] sm:$0xff]  ;;  %v558_v15 = vld [vmem:[%s2111_s5 + $0x198] sm:$0xff] }
  0x76   :  { %993 = vmatprep.subr.bf16.mxu1 %v992_v19  ;;  %v1080_v19 = vpack.c.bf16 %v522_v17, %v520_v16  ;;  %v1116_v17 = vpack.c.bf16 %v558_v15, %v556_v13 }
  0x79   :  { %995 = vmatpush1.bf16.msra.mxu1 %v994_v25  ;;  %v1082_v25 = vpack.c.bf16 %v521_v22, %v519_v21  ;;  %v560_v21 = vld [vmem:[%s2111_s5 + $0x1a8] sm:$0xff]  ;;  %v562_v22 = vld [vmem:[%s2111_s5 + $0x1b8] sm:$0xff] }
  0x7a   :  { %997 = vmatprep.subr.bf16.mxu1 %v996_v26  ;;  %v1084_v26 = vpack.c.bf16 %v526_v24, %v524_v23  ;;  %v1120_v24 = vpack.c.bf16 %v562_v22, %v560_v21 }
  0x7d   :  { %999 = vmatpush1.bf16.msra.mxu1 %v998_v32  ;;  %v1086_v32 = vpack.c.bf16 %v525_v28, %v523_v27  ;;  %v564_v27 = vld [vmem:[%s2111_s5 + $0x1c8] sm:$0xff]  ;;  %v566_v28 = vld [vmem:[%s2111_s5 + $0x1d8] sm:$0xff] }
  0x7e   :  { %1001 = vmatprep.subr.bf16.mxu1 %v1000_v33  ;;  %v1088_v33 = vpack.c.bf16 %v530_v31, %v528_v30  ;;  %v1124_v31 = vpack.c.bf16 %v566_v28, %v564_v27 }
  0x81   :  { %1003 = vmatpush1.bf16.msra.mxu1 %v1002_v36  ;;  %v532_v36 = vld [vmem:[%s2111_s5 + $0xc8] sm:$0xff] }
  0x82   :  { %v1092_v39 = vpack.c.bf16 %v534_v37, %v532_v36  ;;  %v1128_v37 = vpack.c.bf16 %v570_v35, %v568_v34 }
  0x84   :  { %304 = vmatmul.mubr.f32.vlgmr.msra.gmra.mrb[4].mxu1 %v1525_v14  ;;  %v416_v14 = vld [vmem:[%s2110_s4 + $0x1f0] sm:$0xff] }
  0x85   :  { %309 = vmatprep.mubr.f32.mxu1 %v1539_v20  ;;  %v1066_v20 = vpack.c.bf16 %v416_v14, %v414_v40  ;;  %v531_v40 = vld [vmem:[%s2111_s5 + $0xc0] sm:$0xff]  ;;  %v533_v14 = vld [vmem:[%s2111_s5 + $0xd0] sm:$0xff] }
  0x87   :  { %1067 = vmatpush1.bf16.msra.mxu0 %v1066_v20  ;;  %v536_v20 = vld [vmem:[%s2111_s5 + $0xe8] sm:$0xff] }
  0x88   :  { %310 = vmatmul.mubr.f32.gmra.mrb[6].mxu1 %v1561_v29  ;;  %v508_v29 = vld [vmem:[%s2111_s5 + $0x8] sm:$0xff] }
  0x89   :  { %v1068_v43 = vpack.c.bf16 %v510_v42, %v508_v29  ;;  %v538_v29 = vld [vmem:[%s2111_s5 + $0xf8] sm:$0xff]  ;;  %v1094_v42 = vpack.c.bf16 %v533_v14, %v531_v40 }
  0x8b   :  { %1069 = vmatprep.subr.bf16.mxu0 %v1068_v43  ;;  %v1096_v43 = vpack.c.bf16 %v538_v29, %v536_v20 }
 0x117   :  { %v164_v55 = vpop.f32.mrb[0].mxu1 }
 0x118   :  { %v327_v58 = vmul.f32 %v1844_v49, %v164_v55  ;;  %v1866_v59 = vmul.f32 %v1846_v50, %v164_v55  ;;  %v166_v60 = vpop.f32.mrb[1].mxu1  ;;  %v544_v55 = vld [vmem:[%s2111_s5 + $0x128] sm:$0xff] }
 0x119   :  { %v1869_v61 = vmul.f32 %v1848_v51, %v166_v60  ;;  %v328_v62 = vmul.f32 %v1850_v52, %v166_v60  ;;  %v543_v60 = vld [vmem:[%s2111_s5 + $0x120] sm:$0xff] }
 0x11b   :  { %482 = vmatprep.mubr.f32.mxu0 %v328_v62  ;;  %v170_v5 = vpop.f32.mrb[2].mxu1  ;;  %v545_v62 = vld [vmem:[%s2111_s5 + $0x130] sm:$0xff] }
 0x11c   :  { %483 = vmatmul.mubr.f32.vlgmr.msra.gmra.mrb[0].mxu0 %v327_v58  ;;  %v329_v6 = vmul.f32 %v1844_v49, %v170_v5  ;;  %v1886_v7 = vmul.f32 %v1846_v50, %v170_v5  ;;  %v172_v8 = vpop.f32.mrb[3].mxu1  ;;  %v1104_v58 = vpack.c.bf16 %v546_v56, %v544_v55  ;;  %v1106_v1 = vpack.c.bf16 %v545_v62, %v543_v60  ;;  %v552_v5 = vld [vmem:[%s2111_s5 + $0x168] sm:$0xff] }
 0x11d   :  { %1071 = vmatpush1.bf16.msra.mxu0 %v1070_v63  ;;  %v330_v10 = vmul.f32 %v1850_v52, %v172_v8  ;;  %v1890_v11 = vmul.f32 %v1848_v51, %v172_v8  ;;  %v548_v63 = vld [vmem:[%s2111_s5 + $0x148] sm:$0xff]  ;;  %v1110_v8 = vpack.c.bf16 %v549_v4, %v547_v3 }
 0x11e   :  { %1073 = vmatprep.subr.bf16.mxu0 %v1072_v0  ;;  %v550_v0 = vld [vmem:[%s2111_s5 + $0x158] sm:$0xff] }
 0x11f   :  { %488 = vmatprep.mubr.f32.mxu0 %v330_v10  ;;  %v1108_v2 = vpack.c.bf16 %v550_v0, %v548_v63  ;;  %v551_v10 = vld [vmem:[%s2111_s5 + $0x160] sm:$0xff] }
 0x120   :  { %489 = vmatmul.mubr.f32.gmra.mrb[2].mxu0 %v329_v6  ;;  %v554_v6 = vld [vmem:[%s2111_s5 + $0x178] sm:$0xff] }
 0x121   :  { %1075 = vmatpush1.bf16.msra.mxu0 %v1074_v9  ;;  %v1112_v9 = vpack.c.bf16 %v554_v6, %v552_v5 }
 0x122   :  { %1077 = vmatprep.subr.bf16.mxu0 %v1076_v12  ;;  %v553_v12 = vld [vmem:[%s2111_s5 + $0x170] sm:$0xff] }
 0x123   :  { %v1114_v16 = vpack.c.bf16 %v553_v12, %v551_v10 }
 0x125   :  { %1079 = vmatpush1.bf16.msra.mxu0 %v1078_v18  ;;  %v555_v18 = vld [vmem:[%s2111_s5 + $0x180] sm:$0xff] }
 0x126   :  { %1081 = vmatprep.subr.bf16.mxu0 %v1080_v19  ;;  %v557_v19 = vld [vmem:[%s2111_s5 + $0x190] sm:$0xff] }
 0x127   :  { %v1118_v23 = vpack.c.bf16 %v557_v19, %v555_v18 }
 0x129   :  { %1083 = vmatpush1.bf16.msra.mxu0 %v1082_v25  ;;  %v559_v25 = vld [vmem:[%s2111_s5 + $0x1a0] sm:$0xff] }
 0x12a   :  { %1085 = vmatprep.subr.bf16.mxu0 %v1084_v26  ;;  %v561_v26 = vld [vmem:[%s2111_s5 + $0x1b0] sm:$0xff] }
 0x12b   :  { %v1122_v30 = vpack.c.bf16 %v561_v26, %v559_v25 }
 0x12d   :  { %1087 = vmatpush1.bf16.msra.mxu0 %v1086_v32  ;;  %v563_v32 = vld [vmem:[%s2111_s5 + $0x1c0] sm:$0xff] }
 0x12e   :  { %1089 = vmatprep.subr.bf16.mxu0 %v1088_v33  ;;  %v565_v33 = vld [vmem:[%s2111_s5 + $0x1d0] sm:$0xff] }
 0x12f   :  { %v1126_v36 = vpack.c.bf16 %v565_v33, %v563_v32 }
 0x131   :  { %1091 = vmatpush1.bf16.msra.mxu0 %v1090_v38  ;;  %v567_v38 = vld [vmem:[%s2111_s5 + $0x1e0] sm:$0xff] }
 0x132   :  { %1093 = vmatprep.subr.bf16.mxu0 %v1092_v39  ;;  %v569_v39 = vld [vmem:[%s2111_s5 + $0x1f0] sm:$0xff]  ;;  %s1187_s5 = smov [#allocation2]  }
 0x133   :  { %v1130_v40 = vpack.c.bf16 %v569_v39, %v567_v38  ;;  %s867_s13 = sshll.u32 %s1187_s5, 4  ;;  %s868_s13 = int_to_ptr.vmem [resolvable:$true] %s867_s13 }
 0x134   :  { %s1163_s15 = scalar_lea.vmem %s868_s13, 16  ;;  %s1167_s16 = scalar_lea.vmem %s868_s13, 32 }
 0x135   :  { %1095 = vmatpush1.bf16.msra.mxu0 %v1094_v42  ;;  %p1164_p0 = scmp.ne.s32.totalorder %s868_s13, %s1163_s15  ;;  %p1168_p1 = scmp.lt.s32.totalorder %s868_s13, %s868_s13 }
 0x136   :  { %1097 = vmatprep.subr.bf16.mxu0 %v1096_v43  ;;  %p1169_p2 = scmp.lt.s32.totalorder %s1167_s16, %s1163_s15 }
 0x138   :  { %p1170_p3 = por %p1169_p2, %p1168_p1 }
 0x139   :  { %1099 = vmatpush1.bf16.msra.mxu0 %v1098_v41 }
 0x13a   :  { %1101 = vmatprep.subr.bf16.mxu0 %v1100_v48  ;;  %p1171_p4 = pnand %p1170_p3, %p1164_p0 }
 0x13d   :  { %1103 = vmatpush1.bf16.msra.mxu0 %v1102_v57 }
 0x13e   :  { %1105 = vmatprep.subr.bf16.mxu0 %v1104_v58 }
 0x141   :  { %1107 = vmatpush1.bf16.msra.mxu0 %v1106_v1 }
 0x142   :  { %1109 = vmatprep.subr.bf16.mxu0 %v1108_v2 }
 0x145   :  { %1111 = vmatpush1.bf16.msra.mxu0 %v1110_v8 }
 0x146   :  { %1113 = vmatprep.subr.bf16.mxu0 %v1112_v9 }
 0x149   :  { %1115 = vmatpush1.bf16.msra.mxu0 %v1114_v16 }
 0x14a   :  { %1117 = vmatprep.subr.bf16.mxu0 %v1116_v17 }
 0x14d   :  { %1119 = vmatpush1.bf16.msra.mxu0 %v1118_v23 }
 0x14e   :  { %1121 = vmatprep.subr.bf16.mxu0 %v1120_v24 }
 0x151   :  { %1123 = vmatpush1.bf16.msra.mxu0 %v1122_v30 }
 0x152   :  { %1125 = vmatprep.subr.bf16.mxu0 %v1124_v31 }
 0x155   :  { %1127 = vmatpush1.bf16.msra.mxu0 %v1126_v36 }
 0x156   :  { %1129 = vmatprep.subr.bf16.mxu0 %v1128_v37 }
 0x157   :  { %v305_v14 = vpop.f32.mrb[4].mxu1 }
 0x158   :  { %v342_v20 = vmul.f32 %v1846_v50, %v305_v14  ;;  %v307_v29 = vpop.f32.mrb[5].mxu1  ;;  %v346_v41 = vmul.f32 %v1844_v49, %v305_v14 }
 0x159   :  { %v343_v42 = vmul.f32 %v1848_v51, %v307_v29  ;;  %1131 = vmatpush1.bf16.msra.mxu0 %v1130_v40  ;;  %v347_v47 = vmul.f32 %v1850_v52, %v307_v29 }
 0x15b   :  { %v311_v43 = vpop.f32.mrb[6].mxu1  ;;  %494 = vmatprep.mubr.f32.mxu0 %v343_v42 }
 0x15c   :  { %v344_v44 = vmul.f32 %v1846_v50, %v311_v43  ;;  %v313_v45 = vpop.f32.mrb[7].mxu1  ;;  %495 = vmatmul.mubr.f32.gmra.mrb[4].mxu0 %v342_v20  ;;  %v348_v53 = vmul.f32 %v1844_v49, %v311_v43 }
 0x15d   :  { %v345_v46 = vmul.f32 %v1848_v51, %v313_v45  ;;  %v349_v48 = vmul.f32 %v1850_v52, %v313_v45 }
 0x15f   :  { %500 = vmatprep.mubr.f32.mxu0 %v345_v46 }
 0x160   :  { %501 = vmatmul.mubr.f32.gmra.mrb[6].mxu0 %v344_v44 }
 0x161   :  { %635 = vmatprep.mubr.f32.mxu0 %v347_v47 }
 0x164   :  { %636 = vmatmul.mubr.f32.vlgmr.msra.gmra.mrb[8].mxu0 %v346_v41 }
 0x165   :  { %641 = vmatprep.mubr.f32.mxu0 %v349_v48 }
 0x168   :  { %642 = vmatmul.mubr.f32.gmra.mrb[10].mxu0 %v348_v53 }
 0x169   :  { %647 = vmatprep.mubr.f32.mxu0 %v1869_v61 }
 0x16c   :  { %648 = vmatmul.mubr.f32.gmra.mrb[4].mxu0 %v1866_v59 }
 0x16d   :  { %653 = vmatprep.mubr.f32.mxu0 %v1890_v11 }
 0x170   :  { %654 = vmatmul.mubr.f32.gmra.mrb[6].mxu0 %v1886_v7 }
 0x1ef   :  { %v484_v50 = vpop.f32.mrb[0].mxu0 }
 0x1f0   :  { %v486_v51 = vpop.f32.mrb[1].mxu0 }
 0x1f3   :  { %v490_v54 = vpop.f32.mrb[2].mxu0 }
 0x1f4   :  { %v492_v55 = vpop.f32.mrb[3].mxu0 }
 0x237   :  { %v637_v56 = vpop.f32.mrb[8].mxu0 }
 0x238   :  { %v2066_v57 = vsub.f32 %v484_v50, %v637_v56  ;;  %v639_v52 = vpop.f32.mrb[9].mxu0 }
 0x239   :  { %v2068_v58 = vsub.f32 %v486_v51, %v639_v52 }
 0x23a   :  { %v668_v7 = vmul.f32 %v2066_v57, %v2066_v57 }
 0x23b   :  { %v643_v49 = vpop.f32.mrb[10].mxu0  ;;  %v669_v0 = vmul.f32 %v2068_v58, %v2068_v58 }
 0x23c   :  { %v2070_v60 = vsub.f32 %v490_v54, %v643_v49  ;;  %v645_v61 = vpop.f32.mrb[11].mxu0 }
 0x23d   :  { %v2072_v62 = vsub.f32 %v492_v55, %v645_v61 }
 0x23e   :  { %v670_v5 = vmul.f32 %v2070_v60, %v2070_v60 }
 0x23f   :  { %v649_v59 = vpop.f32.mrb[4].mxu0  ;;  %v671_v9 = vmul.f32 %v2072_v62, %v2072_v62 }
 0x240   :  { %v672_v11 = vmul.f32 %v649_v59, %v649_v59  ;;  %v651_v63 = vpop.f32.mrb[5].mxu0 }
 0x241   :  { %v673_v1 = vmul.f32 %v651_v63, %v651_v63 }
 0x242   :  { %v676_v2 = vadd.f32 %v672_v11, %v668_v7 }
 0x243   :  { %v677_v3 = vadd.f32 %v673_v1, %v669_v0  ;;  %v655_v4 = vpop.f32.mrb[6].mxu0 }
 0x244   :  { %1139 = vrsqrt.f32 %v676_v2  ;;  %v674_v6 = vmul.f32 %v655_v4, %v655_v4  ;;  %v657_v8 = vpop.f32.mrb[7].mxu0  ;;  %vm682_vm0 = vcmp.eq.f32.partialorder %v676_v2, inf  ;;  %v685_v18 = vand.u32 2147483648, %v676_v2 }
 0x245   :  { %1141 = vrsqrt.f32 %v677_v3  ;;  %v675_v10 = vmul.f32 %v657_v8, %v657_v8  ;;  %vm684_vm1 = vcmp.eq.f32.partialorder %v676_v2, 0.0  ;;  %vm689_vm2 = vcmp.eq.f32.partialorder %v677_v3, inf }
 0x246   :  { %v678_v12 = vadd.f32 %v674_v6, %v670_v5  ;;  %v692_v22 = vand.u32 2147483648, %v677_v3  ;;  %vm691_vm3 = vcmp.eq.f32.partialorder %v677_v3, 0.0 }
 0x247   :  { %v679_v13 = vadd.f32 %v675_v10, %v671_v9 }
 0x248   :  { %1143 = vrsqrt.f32 %v678_v12  ;;  %vm696_vm4 = vcmp.eq.f32.partialorder %v678_v12, inf  ;;  %vm698_vm5 = vcmp.eq.f32.partialorder %v678_v12, 0.0  ;;  %v699_v31 = vand.u32 2147483648, %v678_v12 }
 0x249   :  { %1145 = vrsqrt.f32 %v679_v13  ;;  %vm703_vm6 = vcmp.eq.f32.partialorder %v679_v13, inf  ;;  %v706_v35 = vand.u32 2147483648, %v679_v13  ;;  %vm705_vm7 = vcmp.eq.f32.partialorder %v679_v13, 0.0 }
 0x24e   :  { %v1140_v15 = vpop.eup %1139 }
 0x24f   :  { %v1142_v16 = vpop.eup %1141  ;;  %v681_v17 = vmul.f32 %v1140_v15, %v676_v2 }
 0x250   :  { %v688_v19 = vmul.f32 %v1142_v16, %v677_v3 }
 0x251   :  { %v683_v21 = vsel %vm682_vm0, %v676_v2, %v681_v17 }
 0x252   :  { %v1144_v23 = vpop.eup %1143  ;;  %v686_v24 = vsel %vm684_vm1, %v685_v18, %v683_v21  ;;  %v690_v25 = vsel %vm689_vm2, %v677_v3, %v688_v19 }
 0x253   :  { %v1146_v26 = vpop.eup %1145  ;;  %v693_v27 = vsel %vm691_vm3, %v692_v22, %v690_v25  ;;  %v695_v28 = vmul.f32 %v1144_v23, %v678_v12  ;;  %v708_v30 = vmul.f32 %v686_v24, %v686_v24 }
 0x254   :  { %v702_v32 = vmul.f32 %v1146_v26, %v679_v13  ;;  %v709_v33 = vmul.f32 %v693_v27, %v693_v27 }
 0x255   :  { %v697_v34 = vsel %vm696_vm4, %v678_v12, %v695_v28  ;;  %v712_v36 = vadd.f32 %v708_v30, %v668_v7  ;;  %vm859_vm4 = vcmask 0  }
 0x256   :  { %v700_v37 = vsel %vm698_vm5, %v699_v31, %v697_v34  ;;  %v704_v38 = vsel %vm703_vm6, %v679_v13, %v702_v32  ;;  %v713_v39 = vadd.f32 %v709_v33, %v669_v0 }
 0x257   :  { %v707_v40 = vsel %vm705_vm7, %v706_v35, %v704_v38  ;;  %v710_v14 = vmul.f32 %v700_v37, %v700_v37  ;;  %1147 = vrsqrt.f32 %v712_v36  ;;  %vm718_vm8 = vcmp.eq.f32.partialorder %v712_v36, inf }
 0x258   :  { %v711_v20 = vmul.f32 %v707_v40, %v707_v40  ;;  %1149 = vrsqrt.f32 %v713_v39  ;;  %v721_v46 = vand.u32 2147483648, %v712_v36  ;;  %vm720_vm9 = vcmp.eq.f32.partialorder %v712_v36, 0.0 }
 0x259   :  { %v714_v29 = vadd.f32 %v710_v14, %v670_v5  ;;  %vm725_vm10 = vcmp.eq.f32.partialorder %v713_v39, inf  ;;  %v728_v48 = vand.u32 2147483648, %v713_v39  ;;  %vm727_vm11 = vcmp.eq.f32.partialorder %v713_v39, 0.0 }
 0x25a   :  { %v715_v42 = vadd.f32 %v711_v20, %v671_v9 }
 0x25b   :  { %1151 = vrsqrt.f32 %v714_v29  ;;  %vm732_vm12 = vcmp.eq.f32.partialorder %v714_v29, inf  ;;  %vm734_vm13 = vcmp.eq.f32.partialorder %v714_v29, 0.0  ;;  %v735_v49 = vand.u32 2147483648, %v714_v29 }
 0x25c   :  { %1153 = vrsqrt.f32 %v715_v42  ;;  %vm739_vm14 = vcmp.eq.f32.partialorder %v715_v42, inf  ;;  %vm741_vm15 = vcmp.eq.f32.partialorder %v715_v42, 0.0  ;;  %v742_v11 = vand.u32 2147483648, %v715_v42 }
 0x261   :  { %v1148_v43 = vpop.eup %1147 }
 0x262   :  { %v1150_v44 = vpop.eup %1149  ;;  %v717_v45 = vmul.f32 %v1148_v43, %v712_v36 }
 0x263   :  { %v724_v47 = vmul.f32 %v1150_v44, %v713_v39 }
 0x264   :  { %v719_v41 = vsel %vm718_vm8, %v712_v36, %v717_v45 }
 0x265   :  { %v1152_v53 = vpop.eup %1151  ;;  %v722_v50 = vsel %vm720_vm9, %v721_v46, %v719_v41  ;;  %v726_v51 = vsel %vm725_vm10, %v713_v39, %v724_v47 }
 0x266   :  { %v1154_v54 = vpop.eup %1153  ;;  %v729_v55 = vsel %vm727_vm11, %v728_v48, %v726_v51  ;;  %v731_v56 = vmul.f32 %v1152_v53, %v714_v29  ;;  %v744_v52 = vadd.f32 %v722_v50, %v686_v24 }
 0x267   :  { %v738_v61 = vmul.f32 %v1154_v54, %v715_v42  ;;  %v745_v59 = vadd.f32 %v729_v55, %v693_v27 }
 0x268   :  { %v733_v7 = vsel %vm732_vm12, %v714_v29, %v731_v56  ;;  %vm748_vm0 = vcmp.gt.f32.partialorder %v744_v52, 0.0 }
 0x269   :  { %v736_v63 = vsel %vm734_vm13, %v735_v49, %v733_v7  ;;  %v740_v0 = vsel %vm739_vm14, %v715_v42, %v738_v61  ;;  %vm749_vm1 = vcmp.gt.f32.partialorder %v745_v59, 0.0  ;;  %v752_v1 = vsel %vm748_vm0, %v744_v52, 1.0 }
 0x26a   :  { %v743_v2 = vsel %vm741_vm15, %v742_v11, %v740_v0  ;;  %v746_v3 = vadd.f32 %v736_v63, %v700_v37  ;;  %v753_v4 = vsel %vm749_vm1, %v745_v59, 1.0  ;;  %1155 = vrcp.f32 %v752_v1 }
 0x26b   :  { %v747_v5 = vadd.f32 %v743_v2, %v707_v40  ;;  %1157 = vrcp.f32 %v753_v4 }
 0x26c   :  { %vm750_vm2 = vcmp.gt.f32.partialorder %v746_v3, 0.0 }
 0x26d   :  { %vm751_vm3 = vcmp.gt.f32.partialorder %v747_v5, 0.0  ;;  %v754_v6 = vsel %vm750_vm2, %v746_v3, 1.0 }
 0x26e   :  { %v755_v8 = vsel %vm751_vm3, %v747_v5, 1.0  ;;  %1159 = vrcp.f32 %v754_v6 }
 0x26f   :  { %1161 = vrcp.f32 %v755_v8 }
 0x274   :  { %v1156_v9 = vpop.eup %1155 }
 0x275   :  { %v1158_v10 = vpop.eup %1157  ;;  %v760_v12 = vmul.f32 %v1156_v9, %v752_v1 }
 0x276   :  { %v761_v13 = vmul.f32 %v1158_v10, %v753_v4 }
 0x277   :  { %v764_v15 = vsub.f32 2.0, %v760_v12 }
 0x278   :  { %v1160_v16 = vpop.eup %1159  ;;  %v765_v17 = vsub.f32 2.0, %v761_v13 }
 0x279   :  { %v1162_v18 = vpop.eup %1161  ;;  %v762_v19 = vmul.f32 %v1160_v16, %v754_v6  ;;  %v768_v21 = vmul.f32 %v1156_v9, %v764_v15 }
 0x27a   :  { %v763_v22 = vmul.f32 %v1162_v18, %v755_v8  ;;  %v769_v23 = vmul.f32 %v1158_v10, %v765_v17 }
 0x27b   :  { %v766_v24 = vsub.f32 2.0, %v762_v19  ;;  %v772_v25 = vmul.f32 %v768_v21, %v2066_v57 }
 0x27c   :  { %v767_v26 = vsub.f32 2.0, %v763_v22  ;;  %v773_v27 = vmul.f32 %v769_v23, %v2068_v58 }
 0x27d   :  { %v770_v28 = vmul.f32 %v1160_v16, %v766_v24  ;;  %v776_v30 = vsel %vm748_vm0, %v772_v25, 0.0 }
 0x27e   :  { %v771_v31 = vmul.f32 %v1162_v18, %v767_v26  ;;  %v777_v32 = vsel %vm749_vm1, %v773_v27, 0.0  ;;  %v780_v33 = vmul.f32 %v776_v30, %v776_v30 }
 0x27f   :  { %v774_v34 = vmul.f32 %v770_v28, %v2070_v60  ;;  %v781_v35 = vmul.f32 %v777_v32, %v777_v32 }
 0x280   :  { %v775_v36 = vmul.f32 %v771_v31, %v2072_v62  ;;  %v784_v37 = vmul.f32 0.07692308, %v780_v33 }
 0x281   :  { %v778_v38 = vsel %vm750_vm2, %v774_v34, 0.0  ;;  %v785_v39 = vmul.f32 0.07692308, %v781_v35 }
 0x282   :  { %v779_v57 = vsel %vm751_vm3, %v775_v36, 0.0  ;;  %v782_v40 = vmul.f32 %v778_v38, %v778_v38  ;;  %v788_v58 = vadd.f32 -0.09090909, %v784_v37 }
 0x283   :  { %v783_v14 = vmul.f32 %v779_v57, %v779_v57  ;;  %v789_v20 = vadd.f32 -0.09090909, %v785_v39 }
 0x284   :  { %v786_v29 = vmul.f32 0.07692308, %v782_v40  ;;  %v792_v42 = vmul.f32 %v788_v58, %v780_v33 }
 0x285   :  { %v787_v43 = vmul.f32 0.07692308, %v783_v14  ;;  %v793_v44 = vmul.f32 %v789_v20, %v781_v35 }
 0x286   :  { %v790_v45 = vadd.f32 -0.09090909, %v786_v29  ;;  %v796_v46 = vadd.f32 0.11111111, %v792_v42 }
 0x287   :  { %v791_v60 = vadd.f32 -0.09090909, %v787_v43  ;;  %v797_v47 = vadd.f32 0.11111111, %v793_v44 }
 0x288   :  { %v794_v41 = vmul.f32 %v790_v45, %v782_v40  ;;  %v800_v62 = vmul.f32 %v796_v46, %v780_v33 }
 0x289   :  { %v795_v48 = vmul.f32 %v791_v60, %v783_v14  ;;  %v801_v53 = vmul.f32 %v797_v47, %v781_v35 }
 0x28a   :  { %v798_v50 = vadd.f32 0.11111111, %v794_v41  ;;  %v804_v51 = vadd.f32 -0.14285715, %v800_v62 }
 0x28b   :  { %v799_v54 = vadd.f32 0.11111111, %v795_v48  ;;  %v805_v55 = vadd.f32 -0.14285715, %v801_v53 }
 0x28c   :  { %v802_v56 = vmul.f32 %v798_v50, %v782_v40  ;;  %v808_v52 = vmul.f32 %v804_v51, %v780_v33 }
 0x28d   :  { %v803_v49 = vmul.f32 %v799_v54, %v783_v14  ;;  %v809_v61 = vmul.f32 %v805_v55, %v781_v35 }
 0x28e   :  { %v806_v59 = vadd.f32 -0.14285715, %v802_v56  ;;  %v812_v7 = vadd.f32 0.2, %v808_v52 }
 0x28f   :  { %v807_v11 = vadd.f32 -0.14285715, %v803_v49  ;;  %v813_v63 = vadd.f32 0.2, %v809_v61 }
 0x290   :  { %v810_v0 = vmul.f32 %v806_v59, %v782_v40  ;;  %v816_v1 = vmul.f32 %v812_v7, %v780_v33 }
 0x291   :  { %v811_v2 = vmul.f32 %v807_v11, %v783_v14  ;;  %v817_v3 = vmul.f32 %v813_v63, %v781_v35 }
 0x292   :  { %v814_v4 = vadd.f32 0.2, %v810_v0  ;;  %v820_v5 = vadd.f32 -0.33333334, %v816_v1 }
 0x293   :  { %v815_v6 = vadd.f32 0.2, %v811_v2  ;;  %v821_v8 = vadd.f32 -0.33333334, %v817_v3 }
 0x294   :  { %v818_v9 = vmul.f32 %v814_v4, %v782_v40  ;;  %v824_v10 = vmul.f32 %v820_v5, %v780_v33 }
 0x295   :  { %v819_v12 = vmul.f32 %v815_v6, %v783_v14  ;;  %v825_v13 = vmul.f32 %v821_v8, %v781_v35 }
 0x296   :  { %v822_v15 = vadd.f32 -0.33333334, %v818_v9  ;;  %v828_v16 = vadd.f32 1.0, %v824_v10 }
 0x297   :  { %v823_v17 = vadd.f32 -0.33333334, %v819_v12  ;;  %v829_v18 = vadd.f32 1.0, %v825_v13 }
 0x298   :  { %v826_v19 = vmul.f32 %v822_v15, %v782_v40  ;;  %v832_v23 = vmul.f32 %v828_v16, %v776_v30 }
 0x299   :  { %v827_v21 = vmul.f32 %v823_v17, %v783_v14  ;;  %v833_v25 = vmul.f32 %v829_v18, %v777_v32 }
 0x29a   :  { %v830_v22 = vadd.f32 1.0, %v826_v19  ;;  %v836_v28 = vmul.f32 2.0, %v832_v23 }
 0x29b   :  { %v831_v24 = vadd.f32 1.0, %v827_v21  ;;  %v837_v34 = vmul.f32 2.0, %v833_v25 }
 0x29c   :  { %v834_v26 = vmul.f32 %v830_v22, %v778_v38 }
 0x29d   :  { %v835_v27 = vmul.f32 %v831_v24, %v779_v57 }
 0x29e   :  { %v838_v31 = vmul.f32 2.0, %v834_v26 }
 0x29f   :  { %v839_v36 = vmul.f32 2.0, %v835_v27 }
 0x2a0   :  { %v840_v37 = vmul.f32 %v838_v31, %v836_v28 }
 0x2a1   :  { %v841_v33 = vmul.f32 %v839_v36, %v837_v34 }
 0x2a2   :  { %v842_v39 = vmax.f32 %v840_v37, 0.0 }
 0x2a3   :  { %v843_v35 = vmax.f32 %v841_v33, 0.0 }
 0x2a4   :  { %v844_v58 = vmin.f32 %v842_v39, 0.0001 }
 0x2a5   :  { %v845_v20 = vmin.f32 %v843_v35, 0.0001 }
 0x2a7   :  { %v846_v29 = vadd.f32 %v845_v20, %v844_v58 }
 0x2a9   :  { %847 = vadd.xlane.f32.xlu0 %v846_v29 }
 0x336   :  { %v848_v40 = vpop.xlane.xlu0 %847 }
 0x337   :  { %v849_v14 = vrot.slane %v848_v40, 4 }
 0x339   :  { %v850_v42 = vadd.f32 %v849_v14, %v848_v40 }
 0x33b   :  { %v851_v30 = vrot.slane %v850_v42, 2 }
 0x33d   :  { %v852_v43 = vadd.f32 %v851_v30, %v850_v42 }
 0x33f   :  { %v853_v32 = vrot.slane %v852_v43, 1 }
 0x341   :  { %v854_v38 = vadd.f32 %v853_v32, %v852_v43 }
 0x343   :  { %1136 = vpush %v854_v38 }
 0x374   :  { %s1137_s0 = spop %1136 }
 0x375   :  { %s856_s14 = smul.f32 10000.0, %s1137_s0 }
 0x377   :  { %v857_v57 = vstv %s856_s14 }
 0x378   :  { %860 = vst.msk [vmem:[#allocation2] sm:$0x1] %vm859_vm4, %v857_v57 }
 0x379   :  { %1174 = shalt.err (!%p1171_p4)
}
 0x37a   :  { %s1175_s1 = scalar_lea.hbm %s2113_s7, 16 }
 0x37b   :  { %p1176_p5 = scmp.ne.s32.totalorder %s2113_s7, %s1175_s1  ;;  %p1179_p6 = scmp.lt.u32.totalorder %s1175_s1, %s2113_s7 }
 0x37d   :  { %p1181_p7 = pnand %p1179_p6, %p1176_p5 }
 0x37f   :  { %1184 = shalt.err (!%p1181_p7)
}
 0x380   :  { %870 = dma.vmem_to_hbm [thread:$0]  %s868_s13, 16, %s2113_s7, [#allocation3]  }
 0x381   :  { %1185 = dma.done.wait [#allocation3], 16  }
 0x382   :  { %1186 = vsyncadd [#allocation3], 4294967280 }
 0x383   :  { %874 = vsyncpa [#allocation3], 1 }

</bundles_post_ra>
